<compile_context>
chip_gen: v7x
topology: tpu7x:2x2x1
jax: 0.10.0
libtpu: 0.0.40
codegen_flags: <defaults>
</compile_context>

<pallas_src>
import functools

import jax
import jax.numpy as jnp
import numpy as np
from jax.experimental import pallas as pl
from jax.experimental.pallas import tpu as pltpu


def _wavefront_cells(R, C):
    """Cells grouped by anti-diagonal d = i + j; within a diagonal, ascending i."""
    diags = []
    for d in range(R + C - 1):
        diag = tuple((i, d - i) for i in range(max(0, d - C + 1), min(d, R - 1) + 1))
        diags.append(diag)
    return tuple(diags)


def _grid_lstm_kernel(x_ref, wih_ref, whh_ref, b_ref,      # inputs
                      h2_ref, c2_ref,                       # outputs
                      pre_ref,                              # scratch
                      *, R, C, B, hid):
    H2 = 2 * hid

    # ---- Prologue: one batched bf16 MXU matmul for the input projection of all
    # R*C cells (already permuted into wavefront order by the wrapper), with the
    # folded bias (b_ih + b_hh); f32 accumulation, stored to VMEM scratch.
    pre_ref[...] = (
        jnp.dot(x_ref[...], wih_ref[...], preferred_element_type=jnp.float32)
        + b_ref[...])

    whh = whh_ref[...]                                       # (H2, G) bf16, loaded once

    # Lane mask selecting the "horizontal" half of a combined (B, H2) state.
    horiz_mask = jax.lax.broadcasted_iota(jnp.int32, (B, H2), 1) < hid
    zeros = jnp.zeros((B, H2), jnp.float32)

    # Per-cell combined (h2, c2) outputs, kept as traced values; the whole sweep
    # is statically unrolled so the scheduler sees the entire dependency chain.
    out_h = {}
    out_c = {}
    last_h2 = last_c2 = None

    off = 0                                                  # cells processed so far
    for diag in _wavefront_cells(R, C):
        n = len(diag)

        # Recurrent input state for every cell on this wavefront:
        #   horizontal half <- first half of (i, j-1)'s output (zero at row start)
        #   vertical   half <- second half of (i-1, j)'s output (zero on first row)
        # Built with a lane select; no lane-axis concatenation is materialized.
        h_cells = []
        c_cells = []
        for (i, j) in diag:
            h_left = out_h[(i, j - 1)] if j > 0 else zeros
            h_up = out_h[(i - 1, j)] if i > 0 else zeros
            c_left = out_c[(i, j - 1)] if j > 0 else zeros
            c_up = out_c[(i - 1, j)] if i > 0 else zeros
            h_cells.append(jnp.where(horiz_mask, h_left, h_up))
            c_cells.append(jnp.where(horiz_mask, c_left, c_up))
        h_in = h_cells[0] if n == 1 else jnp.concatenate(h_cells, axis=0)
        c_in = c_cells[0] if n == 1 else jnp.concatenate(c_cells, axis=0)

        # One fused recurrent matmul for the whole wavefront: bf16 operands,
        # f32 accumulation, single MXU round-trip.
        pre_d = pre_ref[pl.ds(off * B, n * B), :]            # (n*B, G) f32, static slice
        off += n
        gates = pre_d + jnp.dot(h_in.astype(jnp.bfloat16), whh,
                                preferred_element_type=jnp.float32)

        # Nonlinearities: one wide sigmoid over all gates and one tanh over the
        # lane-aligned upper half (contains g); elementwise math stays f32.
        sig = jax.nn.sigmoid(gates)
        t_go = jnp.tanh(gates[:, 2 * H2:4 * H2])
        i_g = sig[:, 0 * H2:1 * H2]
        f_g = sig[:, 1 * H2:2 * H2]
        o_g = sig[:, 3 * H2:4 * H2]
        g_g = t_go[:, 0:H2]

        c2 = f_g * c_in + i_g * g_g                          # (n*B, H2)
        h2 = o_g * jnp.tanh(c2)

        # Scatter per-cell outputs (sublane-aligned row blocks, no lane slicing).
        for k, (i, j) in enumerate(diag):
            h2_k = h2[k * B:(k + 1) * B]
            c2_k = c2[k * B:(k + 1) * B]
            out_h[(i, j)] = h2_k
            out_c[(i, j)] = c2_k
            if (i, j) == (R - 1, C - 1):
                last_h2, last_c2 = h2_k, c2_k

    # ---- Epilogue: the module returns the last cell's (h2, c2); two lane-dense
    # full-width stores.
    h2_ref[...] = last_h2.astype(h2_ref.dtype)
    c2_ref[...] = last_c2.astype(c2_ref.dtype)


@functools.partial(jax.jit, static_argnames=("hidden_size",))
def grid_lstm(x, w_ih, w_hh, b_ih, b_hh, *, hidden_size):
    """x: (R, C, B, input_size). Returns (h2, c2), each (B, 2*hidden_size)."""
    R, C, B, In = x.shape
    hid = hidden_size
    H2 = 2 * hid
    G = 4 * H2

    # Permute the R*C cells into wavefront (anti-diagonal) order so the kernel
    # reads one contiguous pre-projection slab per wavefront.
    cells_flat = [c for diag in _wavefront_cells(R, C) for c in diag]
    perm = np.array([i * C + j for (i, j) in cells_flat], dtype=np.int32)

    x_wf = jnp.asarray(x, jnp.float32).reshape(R * C, B, In)[perm]
    x_wf = x_wf.reshape(R * C * B, In).astype(jnp.bfloat16)

    wih_t = jnp.asarray(w_ih, jnp.float32).T.astype(jnp.bfloat16)   # (In, G)
    whh_t = jnp.asarray(w_hh, jnp.float32).T.astype(jnp.bfloat16)   # (H2, G)
    b = (jnp.asarray(b_ih, jnp.float32)
         + jnp.asarray(b_hh, jnp.float32)).reshape(1, G)            # f32, folded bias

    kernel = functools.partial(_grid_lstm_kernel, R=R, C=C, B=B, hid=hid)

    grid_spec = pltpu.PrefetchScalarGridSpec(
        num_scalar_prefetch=0,
        grid=(1,),                                      # single invocation, fully unrolled
        in_specs=[
            pl.BlockSpec((R * C * B, In), lambda g: (0, 0)),
            pl.BlockSpec((In, G), lambda g: (0, 0)),
            pl.BlockSpec((H2, G), lambda g: (0, 0)),
            pl.BlockSpec((1, G), lambda g: (0, 0)),
        ],
        out_specs=[
            pl.BlockSpec((B, H2), lambda g: (0, 0)),
            pl.BlockSpec((B, H2), lambda g: (0, 0)),
        ],
        scratch_shapes=[
            pltpu.VMEM((R * C * B, G), jnp.float32),    # x@W_ih^T + b, wavefront order
        ],
    )

    h2, c2 = pl.pallas_call(
        kernel,
        out_shape=(jax.ShapeDtypeStruct((B, H2), x.dtype),
                   jax.ShapeDtypeStruct((B, H2), x.dtype)),
        grid_spec=grid_spec,
        compiler_params=pltpu.CompilerParams(
            dimension_semantics=("arbitrary",)),
    )(x_wf, wih_t, whh_t, b)
    return h2, c2


def grid_lstm_ref(x, w_ih, w_hh, b_ih, b_hh, hidden_size,
                  matmul_dtype=jnp.float32):
    """Pure-JAX replica of the PyTorch forward (optionally with bf16 matmul
    operands, to mirror the kernel's MXU numerics)."""
    R, C, B, In = x.shape
    wih_t = jnp.asarray(w_ih, jnp.float32).T.astype(matmul_dtype)
    whh_t = jnp.asarray(w_hh, jnp.float32).T.astype(matmul_dtype)
    bias = jnp.asarray(b_ih, jnp.float32) + jnp.asarray(b_hh, jnp.float32)
    h0 = jnp.zeros((B, hidden_size), jnp.float32)
    hx = [h0] * C
    cx = [h0] * C
    h2 = c2 = None
    for i in range(R):
        h, c = h0, h0
        for j in range(C):
            h_cat = jnp.concatenate([h, hx[j]], axis=1)
            c_cat = jnp.concatenate([c, cx[j]], axis=1)
            gates = (jnp.dot(x[i, j].astype(matmul_dtype), wih_t,
                             preferred_element_type=jnp.float32)
                     + bias
                     + jnp.dot(h_cat.astype(matmul_dtype), whh_t,
                               preferred_element_type=jnp.float32))
            ig, fg, gg, og = jnp.split(gates, 4, axis=1)
            ig = jax.nn.sigmoid(ig)
            fg = jax.nn.sigmoid(fg)
            gg = jnp.tanh(gg)
            og = jax.nn.sigmoid(og)
            c2 = fg * c_cat + ig * gg
            h2 = og * jnp.tanh(c2)
            h, hxj = jnp.split(h2, 2, axis=1)
            c, cxj = jnp.split(c2, 2, axis=1)
            hx[j], cx[j] = hxj, cxj
    return h2, c2


if __name__ == "__main__":
    # Small deterministic problem:
    #   rows R=4, cols C=4, batch B=8, input_size=16, hidden_size=32
    #   -> LSTMCell hidden = 2*hidden_size = 64, gate width G = 256
    R, C, B = 4, 4, 8
    input_size, hidden_size = 16, 32
    H2 = 2 * hidden_size

    key = jax.random.PRNGKey(0)
    kx, k1, k2, k3, k4 = jax.random.split(key, 5)
    scale = 1.0 / np.sqrt(H2)   # matches nn.LSTMCell's uniform init scale
    x = jax.random.normal(kx, (R, C, B, input_size), jnp.float32)
    w_ih = jax.random.uniform(k1, (4 * H2, input_size), jnp.float32, -scale, scale)
    w_hh = jax.random.uniform(k2, (4 * H2, H2), jnp.float32, -scale, scale)
    b_ih = jax.random.uniform(k3, (4 * H2,), jnp.float32, -scale, scale)
    b_hh = jax.random.uniform(k4, (4 * H2,), jnp.float32, -scale, scale)

    h2, c2 = grid_lstm(x, w_ih, w_hh, b_ih, b_hh, hidden_size=hidden_size)
    jax.block_until_ready((h2, c2))

    # Tight check against a reference that uses the same bf16 MXU-operand rounding.
    h2_bf, c2_bf = grid_lstm_ref(x, w_ih, w_hh, b_ih, b_hh, hidden_size,
                                 matmul_dtype=jnp.bfloat16)
    np.testing.assert_allclose(np.asarray(h2), np.asarray(h2_bf), atol=5e-3, rtol=5e-3)
    np.testing.assert_allclose(np.asarray(c2), np.asarray(c2_bf), atol=5e-3, rtol=5e-3)

    # Loose check against the exact f32 reference (bf16 MXU operands shift numerics).
    h2_f32, c2_f32 = grid_lstm_ref(x, w_ih, w_hh, b_ih, b_hh, hidden_size)
    np.testing.assert_allclose(np.asarray(h2), np.asarray(h2_f32), atol=5e-2, rtol=5e-2)
    np.testing.assert_allclose(np.asarray(c2), np.asarray(c2_f32), atol=5e-2, rtol=5e-2)

    print("KERNEL_OK")
</pallas_src>

<mosaic_0001>
module attributes {stable_mosaic.version = 11 : i64} {
  func.func @_grid_lstm_kernel(%arg0: i32, %arg1: memref<128x16xbf16, #tpu.memory_space<vmem>>, %arg2: memref<16x256xbf16, #tpu.memory_space<vmem>>, %arg3: memref<64x256xbf16, #tpu.memory_space<vmem>>, %arg4: memref<1x256xf32, #tpu.memory_space<vmem>>, %arg5: memref<8x64xf32, #tpu.memory_space<vmem>>, %arg6: memref<8x64xf32, #tpu.memory_space<vmem>>, %arg7: memref<128x256xf32, #tpu.memory_space<vmem>>) attributes {dimension_semantics = [#tpu.dimension_semantics<arbitrary>], iteration_bounds = array<i64: 1>, scalar_prefetch = 0 : i64, scratch_operands = 1 : i64, tpu.core_type = #tpu.core_type<tc>, window_params = [{pipeline_mode = #tpu.pipeline_mode<synchronous>, transform_indices = @transform_0, window_bounds = array<i64: 128, 16>}, {pipeline_mode = #tpu.pipeline_mode<synchronous>, transform_indices = @transform_1, window_bounds = array<i64: 16, 256>}, {pipeline_mode = #tpu.pipeline_mode<synchronous>, transform_indices = @transform_2, window_bounds = array<i64: 64, 256>}, {pipeline_mode = #tpu.pipeline_mode<synchronous>, transform_indices = @transform_3, window_bounds = array<i64: 1, 256>}, {pipeline_mode = #tpu.pipeline_mode<synchronous>, transform_indices = @transform_4, window_bounds = array<i64: 8, 64>}, {pipeline_mode = #tpu.pipeline_mode<synchronous>, transform_indices = @transform_5, window_bounds = array<i64: 8, 64>}]} {
    %c0 = arith.constant 0 : index
    %c0_0 = arith.constant 0 : index
    %0 = vector.load %arg1[%c0, %c0_0] : memref<128x16xbf16, #tpu.memory_space<vmem>>, vector<128x16xbf16>
    %c0_1 = arith.constant 0 : index
    %c0_2 = arith.constant 0 : index
    %1 = vector.load %arg2[%c0_1, %c0_2] : memref<16x256xbf16, #tpu.memory_space<vmem>>, vector<16x256xbf16>
    %cst = arith.constant dense<0.000000e+00> : vector<128x256xf32>
    %2 = tpu.matmul %0, %1, %cst {dimension_numbers = #tpu.dot_dimension_numbers<[1], [0], [0], [1], [0, 0, 1, 1], [], []>} : vector<128x16xbf16>, vector<16x256xbf16>, vector<128x256xf32> -> vector<128x256xf32>
    %c0_3 = arith.constant 0 : index
    %c0_4 = arith.constant 0 : index
    %3 = vector.load %arg4[%c0_3, %c0_4] : memref<1x256xf32, #tpu.memory_space<vmem>>, vector<1x256xf32>
    %4 = vector.broadcast %3 : vector<1x256xf32> to vector<128x256xf32>
    %5 = arith.addf %2, %4 : vector<128x256xf32>
    %c0_5 = arith.constant 0 : index
    %c0_6 = arith.constant 0 : index
    %6 = vector.load %arg7[%c0_5, %c0_6] : memref<128x256xf32, #tpu.memory_space<vmem>>, vector<128x256xf32>
    tpu.vector_store %arg7[%c0_5, %c0_6], %5 {strides = array<i32>} : memref<128x256xf32, #tpu.memory_space<vmem>>, vector<128x256xf32>,
    %c0_7 = arith.constant 0 : index
    %c0_8 = arith.constant 0 : index
    %7 = vector.load %arg3[%c0_7, %c0_8] : memref<64x256xbf16, #tpu.memory_space<vmem>>, vector<64x256xbf16>
    %8 = tpu.iota {dimensions = array<i32: 1>} : vector<8x64xi32>
    %c32_i32 = arith.constant 32 : i32
    %9 = vector.broadcast %c32_i32 : i32 to vector<8x64xi32>
    %10 = arith.cmpi slt, %8, %9 : vector<8x64xi32>
    %cst_9 = arith.constant 0.000000e+00 : f32
    %11 = vector.broadcast %cst_9 : f32 to vector<8x64xf32>
    %12 = arith.select %10, %11, %11 : vector<8x64xi1>, vector<8x64xf32>
    %13 = arith.select %10, %11, %11 : vector<8x64xi1>, vector<8x64xf32>
    %c0_10 = arith.constant 0 : index
    %c0_11 = arith.constant 0 : index
    %14 = vector.load %arg7[%c0_10, %c0_11] : memref<128x256xf32, #tpu.memory_space<vmem>>, vector<8x256xf32>
    %15 = arith.truncf %12 : vector<8x64xf32> to vector<8x64xbf16>
    %cst_12 = arith.constant dense<0.000000e+00> : vector<8x256xf32>
    %16 = tpu.matmul %15, %7, %cst_12 {dimension_numbers = #tpu.dot_dimension_numbers<[1], [0], [0], [1], [0, 0, 1, 1], [], []>} : vector<8x64xbf16>, vector<64x256xbf16>, vector<8x256xf32> -> vector<8x256xf32>
    %17 = arith.addf %14, %16 : vector<8x256xf32>
    %18 = arith.negf %17 : vector<8x256xf32>
    %19 = math.exp %18 : vector<8x256xf32>
    %cst_13 = arith.constant 1.000000e+00 : f32
    %20 = vector.broadcast %cst_13 : f32 to vector<8x256xf32>
    %21 = arith.addf %20, %19 : vector<8x256xf32>
    %22 = arith.divf %20, %21 : vector<8x256xf32>
    %23 = vector.extract_strided_slice %17 {offsets = [0, 128], sizes = [8, 128], strides = [1, 1]} : vector<8x256xf32> to vector<8x128xf32>
    %24 = math.tanh %23 : vector<8x128xf32>
    %25 = vector.extract_strided_slice %22 {offsets = [0, 0], sizes = [8, 64], strides = [1, 1]} : vector<8x256xf32> to vector<8x64xf32>
    %26 = vector.extract_strided_slice %22 {offsets = [0, 64], sizes = [8, 64], strides = [1, 1]} : vector<8x256xf32> to vector<8x64xf32>
    %27 = vector.extract_strided_slice %22 {offsets = [0, 192], sizes = [8, 64], strides = [1, 1]} : vector<8x256xf32> to vector<8x64xf32>
    %28 = vector.extract_strided_slice %24 {offsets = [0, 0], sizes = [8, 64], strides = [1, 1]} : vector<8x128xf32> to vector<8x64xf32>
    %29 = arith.mulf %26, %13 : vector<8x64xf32>
    %30 = arith.mulf %25, %28 : vector<8x64xf32>
    %31 = arith.addf %29, %30 : vector<8x64xf32>
    %32 = math.tanh %31 : vector<8x64xf32>
    %33 = arith.mulf %27, %32 : vector<8x64xf32>
    %34 = arith.select %10, %33, %11 : vector<8x64xi1>, vector<8x64xf32>
    %35 = arith.select %10, %31, %11 : vector<8x64xi1>, vector<8x64xf32>
    %36 = arith.select %10, %11, %33 : vector<8x64xi1>, vector<8x64xf32>
    %37 = arith.select %10, %11, %31 : vector<8x64xi1>, vector<8x64xf32>
    %38 = tpu.concatenate %34, %36 in 0 : vector<8x64xf32>, vector<8x64xf32> -> vector<16x64xf32>
    %39 = tpu.concatenate %35, %37 in 0 : vector<8x64xf32>, vector<8x64xf32> -> vector<16x64xf32>
    %c8 = arith.constant 8 : index
    %c0_14 = arith.constant 0 : index
    %40 = vector.load %arg7[%c8, %c0_14] : memref<128x256xf32, #tpu.memory_space<vmem>>, vector<16x256xf32>
    %41 = arith.truncf %38 : vector<16x64xf32> to vector<16x64xbf16>
    %cst_15 = arith.constant dense<0.000000e+00> : vector<16x256xf32>
    %42 = tpu.matmul %41, %7, %cst_15 {dimension_numbers = #tpu.dot_dimension_numbers<[1], [0], [0], [1], [0, 0, 1, 1], [], []>} : vector<16x64xbf16>, vector<64x256xbf16>, vector<16x256xf32> -> vector<16x256xf32>
    %43 = arith.addf %40, %42 : vector<16x256xf32>
    %44 = arith.negf %43 : vector<16x256xf32>
    %45 = math.exp %44 : vector<16x256xf32>
    %cst_16 = arith.constant 1.000000e+00 : f32
    %46 = vector.broadcast %cst_16 : f32 to vector<16x256xf32>
    %47 = arith.addf %46, %45 : vector<16x256xf32>
    %48 = arith.divf %46, %47 : vector<16x256xf32>
    %49 = vector.extract_strided_slice %43 {offsets = [0, 128], sizes = [16, 128], strides = [1, 1]} : vector<16x256xf32> to vector<16x128xf32>
    %50 = math.tanh %49 : vector<16x128xf32>
    %51 = vector.extract_strided_slice %48 {offsets = [0, 0], sizes = [16, 64], strides = [1, 1]} : vector<16x256xf32> to vector<16x64xf32>
    %52 = vector.extract_strided_slice %48 {offsets = [0, 64], sizes = [16, 64], strides = [1, 1]} : vector<16x256xf32> to vector<16x64xf32>
    %53 = vector.extract_strided_slice %48 {offsets = [0, 192], sizes = [16, 64], strides = [1, 1]} : vector<16x256xf32> to vector<16x64xf32>
    %54 = vector.extract_strided_slice %50 {offsets = [0, 0], sizes = [16, 64], strides = [1, 1]} : vector<16x128xf32> to vector<16x64xf32>
    %55 = arith.mulf %52, %39 : vector<16x64xf32>
    %56 = arith.mulf %51, %54 : vector<16x64xf32>
    %57 = arith.addf %55, %56 : vector<16x64xf32>
    %58 = math.tanh %57 : vector<16x64xf32>
    %59 = arith.mulf %53, %58 : vector<16x64xf32>
    %60 = vector.extract_strided_slice %59 {offsets = [0, 0], sizes = [8, 64], strides = [1, 1]} : vector<16x64xf32> to vector<8x64xf32>
    %61 = vector.extract_strided_slice %57 {offsets = [0, 0], sizes = [8, 64], strides = [1, 1]} : vector<16x64xf32> to vector<8x64xf32>
    %62 = vector.extract_strided_slice %59 {offsets = [8, 0], sizes = [8, 64], strides = [1, 1]} : vector<16x64xf32> to vector<8x64xf32>
    %63 = vector.extract_strided_slice %57 {offsets = [8, 0], sizes = [8, 64], strides = [1, 1]} : vector<16x64xf32> to vector<8x64xf32>
    %64 = arith.select %10, %60, %11 : vector<8x64xi1>, vector<8x64xf32>
    %65 = arith.select %10, %61, %11 : vector<8x64xi1>, vector<8x64xf32>
    %66 = arith.select %10, %62, %60 : vector<8x64xi1>, vector<8x64xf32>
    %67 = arith.select %10, %63, %61 : vector<8x64xi1>, vector<8x64xf32>
    %68 = arith.select %10, %11, %62 : vector<8x64xi1>, vector<8x64xf32>
    %69 = arith.select %10, %11, %63 : vector<8x64xi1>, vector<8x64xf32>
    %70 = tpu.concatenate %64, %66, %68 in 0 : vector<8x64xf32>, vector<8x64xf32>, vector<8x64xf32> -> vector<24x64xf32>
    %71 = tpu.concatenate %65, %67, %69 in 0 : vector<8x64xf32>, vector<8x64xf32>, vector<8x64xf32> -> vector<24x64xf32>
    %c24 = arith.constant 24 : index
    %c0_17 = arith.constant 0 : index
    %72 = vector.load %arg7[%c24, %c0_17] : memref<128x256xf32, #tpu.memory_space<vmem>>, vector<24x256xf32>
    %73 = arith.truncf %70 : vector<24x64xf32> to vector<24x64xbf16>
    %cst_18 = arith.constant dense<0.000000e+00> : vector<24x256xf32>
    %74 = tpu.matmul %73, %7, %cst_18 {dimension_numbers = #tpu.dot_dimension_numbers<[1], [0], [0], [1], [0, 0, 1, 1], [], []>} : vector<24x64xbf16>, vector<64x256xbf16>, vector<24x256xf32> -> vector<24x256xf32>
    %75 = arith.addf %72, %74 : vector<24x256xf32>
    %76 = arith.negf %75 : vector<24x256xf32>
    %77 = math.exp %76 : vector<24x256xf32>
    %cst_19 = arith.constant 1.000000e+00 : f32
    %78 = vector.broadcast %cst_19 : f32 to vector<24x256xf32>
    %79 = arith.addf %78, %77 : vector<24x256xf32>
    %80 = arith.divf %78, %79 : vector<24x256xf32>
    %81 = vector.extract_strided_slice %75 {offsets = [0, 128], sizes = [24, 128], strides = [1, 1]} : vector<24x256xf32> to vector<24x128xf32>
    %82 = math.tanh %81 : vector<24x128xf32>
    %83 = vector.extract_strided_slice %80 {offsets = [0, 0], sizes = [24, 64], strides = [1, 1]} : vector<24x256xf32> to vector<24x64xf32>
    %84 = vector.extract_strided_slice %80 {offsets = [0, 64], sizes = [24, 64], strides = [1, 1]} : vector<24x256xf32> to vector<24x64xf32>
    %85 = vector.extract_strided_slice %80 {offsets = [0, 192], sizes = [24, 64], strides = [1, 1]} : vector<24x256xf32> to vector<24x64xf32>
    %86 = vector.extract_strided_slice %82 {offsets = [0, 0], sizes = [24, 64], strides = [1, 1]} : vector<24x128xf32> to vector<24x64xf32>
    %87 = arith.mulf %84, %71 : vector<24x64xf32>
    %88 = arith.mulf %83, %86 : vector<24x64xf32>
    %89 = arith.addf %87, %88 : vector<24x64xf32>
    %90 = math.tanh %89 : vector<24x64xf32>
    %91 = arith.mulf %85, %90 : vector<24x64xf32>
    %92 = vector.extract_strided_slice %91 {offsets = [0, 0], sizes = [8, 64], strides = [1, 1]} : vector<24x64xf32> to vector<8x64xf32>
    %93 = vector.extract_strided_slice %89 {offsets = [0, 0], sizes = [8, 64], strides = [1, 1]} : vector<24x64xf32> to vector<8x64xf32>
    %94 = vector.extract_strided_slice %91 {offsets = [8, 0], sizes = [8, 64], strides = [1, 1]} : vector<24x64xf32> to vector<8x64xf32>
    %95 = vector.extract_strided_slice %89 {offsets = [8, 0], sizes = [8, 64], strides = [1, 1]} : vector<24x64xf32> to vector<8x64xf32>
    %96 = vector.extract_strided_slice %91 {offsets = [16, 0], sizes = [8, 64], strides = [1, 1]} : vector<24x64xf32> to vector<8x64xf32>
    %97 = vector.extract_strided_slice %89 {offsets = [16, 0], sizes = [8, 64], strides = [1, 1]} : vector<24x64xf32> to vector<8x64xf32>
    %98 = arith.select %10, %92, %11 : vector<8x64xi1>, vector<8x64xf32>
    %99 = arith.select %10, %93, %11 : vector<8x64xi1>, vector<8x64xf32>
    %100 = arith.select %10, %94, %92 : vector<8x64xi1>, vector<8x64xf32>
    %101 = arith.select %10, %95, %93 : vector<8x64xi1>, vector<8x64xf32>
    %102 = arith.select %10, %96, %94 : vector<8x64xi1>, vector<8x64xf32>
    %103 = arith.select %10, %97, %95 : vector<8x64xi1>, vector<8x64xf32>
    %104 = arith.select %10, %11, %96 : vector<8x64xi1>, vector<8x64xf32>
    %105 = arith.select %10, %11, %97 : vector<8x64xi1>, vector<8x64xf32>
    %106 = tpu.concatenate %98, %100, %102, %104 in 0 : vector<8x64xf32>, vector<8x64xf32>, vector<8x64xf32>, vector<8x64xf32> -> vector<32x64xf32>
    %107 = tpu.concatenate %99, %101, %103, %105 in 0 : vector<8x64xf32>, vector<8x64xf32>, vector<8x64xf32>, vector<8x64xf32> -> vector<32x64xf32>
    %c48 = arith.constant 48 : index
    %c0_20 = arith.constant 0 : index
    %108 = vector.load %arg7[%c48, %c0_20] : memref<128x256xf32, #tpu.memory_space<vmem>>, vector<32x256xf32>
    %109 = arith.truncf %106 : vector<32x64xf32> to vector<32x64xbf16>
    %cst_21 = arith.constant dense<0.000000e+00> : vector<32x256xf32>
    %110 = tpu.matmul %109, %7, %cst_21 {dimension_numbers = #tpu.dot_dimension_numbers<[1], [0], [0], [1], [0, 0, 1, 1], [], []>} : vector<32x64xbf16>, vector<64x256xbf16>, vector<32x256xf32> -> vector<32x256xf32>
    %111 = arith.addf %108, %110 : vector<32x256xf32>
    %112 = arith.negf %111 : vector<32x256xf32>
    %113 = math.exp %112 : vector<32x256xf32>
    %cst_22 = arith.constant 1.000000e+00 : f32
    %114 = vector.broadcast %cst_22 : f32 to vector<32x256xf32>
    %115 = arith.addf %114, %113 : vector<32x256xf32>
    %116 = arith.divf %114, %115 : vector<32x256xf32>
    %117 = vector.extract_strided_slice %111 {offsets = [0, 128], sizes = [32, 128], strides = [1, 1]} : vector<32x256xf32> to vector<32x128xf32>
    %118 = math.tanh %117 : vector<32x128xf32>
    %119 = vector.extract_strided_slice %116 {offsets = [0, 0], sizes = [32, 64], strides = [1, 1]} : vector<32x256xf32> to vector<32x64xf32>
    %120 = vector.extract_strided_slice %116 {offsets = [0, 64], sizes = [32, 64], strides = [1, 1]} : vector<32x256xf32> to vector<32x64xf32>
    %121 = vector.extract_strided_slice %116 {offsets = [0, 192], sizes = [32, 64], strides = [1, 1]} : vector<32x256xf32> to vector<32x64xf32>
    %122 = vector.extract_strided_slice %118 {offsets = [0, 0], sizes = [32, 64], strides = [1, 1]} : vector<32x128xf32> to vector<32x64xf32>
    %123 = arith.mulf %120, %107 : vector<32x64xf32>
    %124 = arith.mulf %119, %122 : vector<32x64xf32>
    %125 = arith.addf %123, %124 : vector<32x64xf32>
    %126 = math.tanh %125 : vector<32x64xf32>
    %127 = arith.mulf %121, %126 : vector<32x64xf32>
    %128 = vector.extract_strided_slice %127 {offsets = [0, 0], sizes = [8, 64], strides = [1, 1]} : vector<32x64xf32> to vector<8x64xf32>
    %129 = vector.extract_strided_slice %125 {offsets = [0, 0], sizes = [8, 64], strides = [1, 1]} : vector<32x64xf32> to vector<8x64xf32>
    %130 = vector.extract_strided_slice %127 {offsets = [8, 0], sizes = [8, 64], strides = [1, 1]} : vector<32x64xf32> to vector<8x64xf32>
    %131 = vector.extract_strided_slice %125 {offsets = [8, 0], sizes = [8, 64], strides = [1, 1]} : vector<32x64xf32> to vector<8x64xf32>
    %132 = vector.extract_strided_slice %127 {offsets = [16, 0], sizes = [8, 64], strides = [1, 1]} : vector<32x64xf32> to vector<8x64xf32>
    %133 = vector.extract_strided_slice %125 {offsets = [16, 0], sizes = [8, 64], strides = [1, 1]} : vector<32x64xf32> to vector<8x64xf32>
    %134 = vector.extract_strided_slice %127 {offsets = [24, 0], sizes = [8, 64], strides = [1, 1]} : vector<32x64xf32> to vector<8x64xf32>
    %135 = vector.extract_strided_slice %125 {offsets = [24, 0], sizes = [8, 64], strides = [1, 1]} : vector<32x64xf32> to vector<8x64xf32>
    %136 = arith.select %10, %130, %128 : vector<8x64xi1>, vector<8x64xf32>
    %137 = arith.select %10, %131, %129 : vector<8x64xi1>, vector<8x64xf32>
    %138 = arith.select %10, %132, %130 : vector<8x64xi1>, vector<8x64xf32>
    %139 = arith.select %10, %133, %131 : vector<8x64xi1>, vector<8x64xf32>
    %140 = arith.select %10, %134, %132 : vector<8x64xi1>, vector<8x64xf32>
    %141 = arith.select %10, %135, %133 : vector<8x64xi1>, vector<8x64xf32>
    %142 = tpu.concatenate %136, %138, %140 in 0 : vector<8x64xf32>, vector<8x64xf32>, vector<8x64xf32> -> vector<24x64xf32>
    %143 = tpu.concatenate %137, %139, %141 in 0 : vector<8x64xf32>, vector<8x64xf32>, vector<8x64xf32> -> vector<24x64xf32>
    %c80 = arith.constant 80 : index
    %c0_23 = arith.constant 0 : index
    %144 = vector.load %arg7[%c80, %c0_23] : memref<128x256xf32, #tpu.memory_space<vmem>>, vector<24x256xf32>
    %145 = arith.truncf %142 : vector<24x64xf32> to vector<24x64xbf16>
    %cst_24 = arith.constant dense<0.000000e+00> : vector<24x256xf32>
    %146 = tpu.matmul %145, %7, %cst_24 {dimension_numbers = #tpu.dot_dimension_numbers<[1], [0], [0], [1], [0, 0, 1, 1], [], []>} : vector<24x64xbf16>, vector<64x256xbf16>, vector<24x256xf32> -> vector<24x256xf32>
    %147 = arith.addf %144, %146 : vector<24x256xf32>
    %148 = arith.negf %147 : vector<24x256xf32>
    %149 = math.exp %148 : vector<24x256xf32>
    %cst_25 = arith.constant 1.000000e+00 : f32
    %150 = vector.broadcast %cst_25 : f32 to vector<24x256xf32>
    %151 = arith.addf %150, %149 : vector<24x256xf32>
    %152 = arith.divf %150, %151 : vector<24x256xf32>
    %153 = vector.extract_strided_slice %147 {offsets = [0, 128], sizes = [24, 128], strides = [1, 1]} : vector<24x256xf32> to vector<24x128xf32>
    %154 = math.tanh %153 : vector<24x128xf32>
    %155 = vector.extract_strided_slice %152 {offsets = [0, 0], sizes = [24, 64], strides = [1, 1]} : vector<24x256xf32> to vector<24x64xf32>
    %156 = vector.extract_strided_slice %152 {offsets = [0, 64], sizes = [24, 64], strides = [1, 1]} : vector<24x256xf32> to vector<24x64xf32>
    %157 = vector.extract_strided_slice %152 {offsets = [0, 192], sizes = [24, 64], strides = [1, 1]} : vector<24x256xf32> to vector<24x64xf32>
    %158 = vector.extract_strided_slice %154 {offsets = [0, 0], sizes = [24, 64], strides = [1, 1]} : vector<24x128xf32> to vector<24x64xf32>
    %159 = arith.mulf %156, %143 : vector<24x64xf32>
    %160 = arith.mulf %155, %158 : vector<24x64xf32>
    %161 = arith.addf %159, %160 : vector<24x64xf32>
    %162 = math.tanh %161 : vector<24x64xf32>
    %163 = arith.mulf %157, %162 : vector<24x64xf32>
    %164 = vector.extract_strided_slice %163 {offsets = [0, 0], sizes = [8, 64], strides = [1, 1]} : vector<24x64xf32> to vector<8x64xf32>
    %165 = vector.extract_strided_slice %161 {offsets = [0, 0], sizes = [8, 64], strides = [1, 1]} : vector<24x64xf32> to vector<8x64xf32>
    %166 = vector.extract_strided_slice %163 {offsets = [8, 0], sizes = [8, 64], strides = [1, 1]} : vector<24x64xf32> to vector<8x64xf32>
    %167 = vector.extract_strided_slice %161 {offsets = [8, 0], sizes = [8, 64], strides = [1, 1]} : vector<24x64xf32> to vector<8x64xf32>
    %168 = vector.extract_strided_slice %163 {offsets = [16, 0], sizes = [8, 64], strides = [1, 1]} : vector<24x64xf32> to vector<8x64xf32>
    %169 = vector.extract_strided_slice %161 {offsets = [16, 0], sizes = [8, 64], strides = [1, 1]} : vector<24x64xf32> to vector<8x64xf32>
    %170 = arith.select %10, %166, %164 : vector<8x64xi1>, vector<8x64xf32>
    %171 = arith.select %10, %167, %165 : vector<8x64xi1>, vector<8x64xf32>
    %172 = arith.select %10, %168, %166 : vector<8x64xi1>, vector<8x64xf32>
    %173 = arith.select %10, %169, %167 : vector<8x64xi1>, vector<8x64xf32>
    %174 = tpu.concatenate %170, %172 in 0 : vector<8x64xf32>, vector<8x64xf32> -> vector<16x64xf32>
    %175 = tpu.concatenate %171, %173 in 0 : vector<8x64xf32>, vector<8x64xf32> -> vector<16x64xf32>
    %c104 = arith.constant 104 : index
    %c0_26 = arith.constant 0 : index
    %176 = vector.load %arg7[%c104, %c0_26] : memref<128x256xf32, #tpu.memory_space<vmem>>, vector<16x256xf32>
    %177 = arith.truncf %174 : vector<16x64xf32> to vector<16x64xbf16>
    %cst_27 = arith.constant dense<0.000000e+00> : vector<16x256xf32>
    %178 = tpu.matmul %177, %7, %cst_27 {dimension_numbers = #tpu.dot_dimension_numbers<[1], [0], [0], [1], [0, 0, 1, 1], [], []>} : vector<16x64xbf16>, vector<64x256xbf16>, vector<16x256xf32> -> vector<16x256xf32>
    %179 = arith.addf %176, %178 : vector<16x256xf32>
    %180 = arith.negf %179 : vector<16x256xf32>
    %181 = math.exp %180 : vector<16x256xf32>
    %cst_28 = arith.constant 1.000000e+00 : f32
    %182 = vector.broadcast %cst_28 : f32 to vector<16x256xf32>
    %183 = arith.addf %182, %181 : vector<16x256xf32>
    %184 = arith.divf %182, %183 : vector<16x256xf32>
    %185 = vector.extract_strided_slice %179 {offsets = [0, 128], sizes = [16, 128], strides = [1, 1]} : vector<16x256xf32> to vector<16x128xf32>
    %186 = math.tanh %185 : vector<16x128xf32>
    %187 = vector.extract_strided_slice %184 {offsets = [0, 0], sizes = [16, 64], strides = [1, 1]} : vector<16x256xf32> to vector<16x64xf32>
    %188 = vector.extract_strided_slice %184 {offsets = [0, 64], sizes = [16, 64], strides = [1, 1]} : vector<16x256xf32> to vector<16x64xf32>
    %189 = vector.extract_strided_slice %184 {offsets = [0, 192], sizes = [16, 64], strides = [1, 1]} : vector<16x256xf32> to vector<16x64xf32>
    %190 = vector.extract_strided_slice %186 {offsets = [0, 0], sizes = [16, 64], strides = [1, 1]} : vector<16x128xf32> to vector<16x64xf32>
    %191 = arith.mulf %188, %175 : vector<16x64xf32>
    %192 = arith.mulf %187, %190 : vector<16x64xf32>
    %193 = arith.addf %191, %192 : vector<16x64xf32>
    %194 = math.tanh %193 : vector<16x64xf32>
    %195 = arith.mulf %189, %194 : vector<16x64xf32>
    %196 = vector.extract_strided_slice %195 {offsets = [0, 0], sizes = [8, 64], strides = [1, 1]} : vector<16x64xf32> to vector<8x64xf32>
    %197 = vector.extract_strided_slice %193 {offsets = [0, 0], sizes = [8, 64], strides = [1, 1]} : vector<16x64xf32> to vector<8x64xf32>
    %198 = vector.extract_strided_slice %195 {offsets = [8, 0], sizes = [8, 64], strides = [1, 1]} : vector<16x64xf32> to vector<8x64xf32>
    %199 = vector.extract_strided_slice %193 {offsets = [8, 0], sizes = [8, 64], strides = [1, 1]} : vector<16x64xf32> to vector<8x64xf32>
    %200 = arith.select %10, %198, %196 : vector<8x64xi1>, vector<8x64xf32>
    %201 = arith.select %10, %199, %197 : vector<8x64xi1>, vector<8x64xf32>
    %c120 = arith.constant 120 : index
    %c0_29 = arith.constant 0 : index
    %202 = vector.load %arg7[%c120, %c0_29] : memref<128x256xf32, #tpu.memory_space<vmem>>, vector<8x256xf32>
    %203 = arith.truncf %200 : vector<8x64xf32> to vector<8x64xbf16>
    %cst_30 = arith.constant dense<0.000000e+00> : vector<8x256xf32>
    %204 = tpu.matmul %203, %7, %cst_30 {dimension_numbers = #tpu.dot_dimension_numbers<[1], [0], [0], [1], [0, 0, 1, 1], [], []>} : vector<8x64xbf16>, vector<64x256xbf16>, vector<8x256xf32> -> vector<8x256xf32>
    %205 = arith.addf %202, %204 : vector<8x256xf32>
    %206 = arith.negf %205 : vector<8x256xf32>
    %207 = math.exp %206 : vector<8x256xf32>
    %cst_31 = arith.constant 1.000000e+00 : f32
    %208 = vector.broadcast %cst_31 : f32 to vector<8x256xf32>
    %209 = arith.addf %208, %207 : vector<8x256xf32>
    %210 = arith.divf %208, %209 : vector<8x256xf32>
    %211 = vector.extract_strided_slice %205 {offsets = [0, 128], sizes = [8, 128], strides = [1, 1]} : vector<8x256xf32> to vector<8x128xf32>
    %212 = math.tanh %211 : vector<8x128xf32>
    %213 = vector.extract_strided_slice %210 {offsets = [0, 0], sizes = [8, 64], strides = [1, 1]} : vector<8x256xf32> to vector<8x64xf32>
    %214 = vector.extract_strided_slice %210 {offsets = [0, 64], sizes = [8, 64], strides = [1, 1]} : vector<8x256xf32> to vector<8x64xf32>
    %215 = vector.extract_strided_slice %210 {offsets = [0, 192], sizes = [8, 64], strides = [1, 1]} : vector<8x256xf32> to vector<8x64xf32>
    %216 = vector.extract_strided_slice %212 {offsets = [0, 0], sizes = [8, 64], strides = [1, 1]} : vector<8x128xf32> to vector<8x64xf32>
    %217 = arith.mulf %214, %201 : vector<8x64xf32>
    %218 = arith.mulf %213, %216 : vector<8x64xf32>
    %219 = arith.addf %217, %218 : vector<8x64xf32>
    %220 = math.tanh %219 : vector<8x64xf32>
    %221 = arith.mulf %215, %220 : vector<8x64xf32>
    %c0_32 = arith.constant 0 : index
    %c0_33 = arith.constant 0 : index
    %222 = vector.load %arg5[%c0_32, %c0_33] : memref<8x64xf32, #tpu.memory_space<vmem>>, vector<8x64xf32>
    tpu.vector_store %arg5[%c0_32, %c0_33], %221 {strides = array<i32>} : memref<8x64xf32, #tpu.memory_space<vmem>>, vector<8x64xf32>,
    %c0_34 = arith.constant 0 : index
    %c0_35 = arith.constant 0 : index
    %223 = vector.load %arg6[%c0_34, %c0_35] : memref<8x64xf32, #tpu.memory_space<vmem>>, vector<8x64xf32>
    tpu.vector_store %arg6[%c0_34, %c0_35], %219 {strides = array<i32>} : memref<8x64xf32, #tpu.memory_space<vmem>>, vector<8x64xf32>,
    return
  }
  func.func @transform_0(%arg0: i32) -> (i32, i32) {
    %c0_i32 = arith.constant 0 : i32
    %c0_i32_0 = arith.constant 0 : i32
    %c0_i32_1 = arith.constant 0 : i32
    return %c0_i32, %c0_i32_0 : i32, i32
  }
  func.func @transform_1(%arg0: i32) -> (i32, i32) {
    %c0_i32 = arith.constant 0 : i32
    %c0_i32_0 = arith.constant 0 : i32
    %c0_i32_1 = arith.constant 0 : i32
    return %c0_i32, %c0_i32_0 : i32, i32
  }
  func.func @transform_2(%arg0: i32) -> (i32, i32) {
    %c0_i32 = arith.constant 0 : i32
    %c0_i32_0 = arith.constant 0 : i32
    %c0_i32_1 = arith.constant 0 : i32
    return %c0_i32, %c0_i32_0 : i32, i32
  }
  func.func @transform_3(%arg0: i32) -> (i32, i32) {
    %c0_i32 = arith.constant 0 : i32
    %c0_i32_0 = arith.constant 0 : i32
    %c0_i32_1 = arith.constant 0 : i32
    return %c0_i32, %c0_i32_0 : i32, i32
  }
  func.func @transform_4(%arg0: i32) -> (i32, i32) {
    %c0_i32 = arith.constant 0 : i32
    %c0_i32_0 = arith.constant 0 : i32
    %c0_i32_1 = arith.constant 0 : i32
    return %c0_i32, %c0_i32_0 : i32, i32
  }
  func.func @transform_5(%arg0: i32) -> (i32, i32) {
    %c0_i32 = arith.constant 0 : i32
    %c0_i32_0 = arith.constant 0 : i32
    %c0_i32_1 = arith.constant 0 : i32
    return %c0_i32, %c0_i32_0 : i32, i32
  }
}

</mosaic_0001>

<bundles_post_ra>
// kernel: grid_lstm.1
= control target key start
LH: loop header
LB: loop body
LE: loop exit
PB: predicated region body
PF: predicated region fallthrough
CT: control target
= control target key end

     0   :  { %11 = vsyncpa [#allocation4], 0  ;;  %v1740_v2 = vmov 0   ;;  %vm102_vm0 = vcmask 130048   ;;  %s2180_s0 = inlined_call_operand.vmem [shape: bf16[128,16], index: 0, kind: input, shape index: {}]   ;;  %s2181_s1 = inlined_call_operand.vmem [shape: bf16[16,256], index: 1, kind: input, shape index: {}]   ;;  %s2182_s2 = inlined_call_operand.vmem [shape: bf16[64,256], index: 2, kind: input, shape index: {}]   ;;  %s2183_s3 = inlined_call_operand.vmem [shape: f32[1,256], index: 3, kind: input, shape index: {}]   ;;  %s2184_s4 = inlined_call_operand.hbm [shape: f32[8,64], index: 4, kind: output, shape index: {0}]   ;;  %s2185_s5 = inlined_call_operand.hbm [shape: f32[8,64], index: 5, kind: output, shape index: {1}]  }
   0x1   :  { %v1777_v0 = vld [vmem:[%s2182_s2 + $0x4] ss:$8 sps:$4 sm:$0xff]   ;;  %v1782_v1 = vld [vmem:[%s2182_s2] ss:$8 sps:$4 sm:$0xff]   ;;  %159 = vmatprep.mubr.bf16.mxu0 %v1740_v2  ;;  %361 = vmatprep.mubr.bf16.mxu1 %v1740_v2  ;;  %v1790_v3 = vld [vmem:[%s2182_s2 + $0x14] ss:$8 sps:$4 sm:$0xff]  }
   0x2   :  { %329 = vmatprep.subr.bf16.mxu1 %v1777_v0  ;;  %v1795_v4 = vld [vmem:[%s2182_s2 + $0x10] ss:$8 sps:$4 sm:$0xff]   ;;  %v1476_v5 = vld [vmem:[%s2181_s1 + $0x4] ss:$8 sps:$4 sm:$0xff]   ;;  %v1478_v6 = vld [vmem:[%s2181_s1] ss:$8 sps:$4 sm:$0xff]  }
   0x3   :  { %330 = vmatpush1.bf16.msra.mxu1 %v1782_v1  ;;  %v1808_v7 = vld [vmem:[%s2182_s2 + $0x24] ss:$8 sps:$4 sm:$0xff]   ;;  %127 = vmatprep.subr.bf16.mxu0 %v1476_v5  ;;  %v1817_v9 = vld [vmem:[%s2182_s2 + $0x20] ss:$8 sps:$4 sm:$0xff]   ;;  %v1822_v10 = vld [vmem:[%s2182_s2 + $0x34] ss:$8 sps:$4 sm:$0xff]  }
   0x4   :  { %331 = vmatprep.subr.bf16.mxu1 %v1790_v3  ;;  %128 = vmatpush1.bf16.msra.mxu0 %v1478_v6  ;;  %v1482_v8 = vld [vmem:[%s2180_s0] sm:$0xff]   ;;  %v1830_v11 = vld [vmem:[%s2182_s2 + $0x30] ss:$8 sps:$4 sm:$0xff]  }
   0x5   :  { %732 = vmatprep.subr.bf16.mxu0 %v1777_v0 }
   0x7   :  { %332 = vmatpush1.bf16.msra.mxu1 %v1795_v4  ;;  %1360 = vmatmul.mubr.msk.bf16.vlgmr.msra.gmra.mrb[0].mxu0 %vm102_vm0, %v1482_v8 }
   0x8   :  { %333 = vmatprep.subr.bf16.mxu1 %v1808_v7  ;;  %169 = vmatprep.mubr.bf16.mxu0 %v1740_v2 }
   0x9   :  { %733 = vmatpush1.bf16.msra.mxu0 %v1782_v1 }
   0xa   :  { %734 = vmatprep.subr.bf16.mxu0 %v1790_v3 }
   0xb   :  { %334 = vmatpush1.bf16.msra.mxu1 %v1817_v9 }
   0xc   :  { %335 = vmatprep.subr.bf16.mxu1 %v1822_v10 }
   0xd   :  { %12 = vsyncpa [#allocation6], 0  ;;  %735 = vmatpush1.bf16.msra.mxu0 %v1795_v4  ;;  %v42_v12 = vlaneseq  ;;  %v40_v15 = vld [vmem:[%s2183_s3] sm:$0x3]  ;;  %s1741_s3 = smov 64   ;;  %v1486_v43 = vld [vmem:[%s2180_s0 + $0x8] sm:$0xff]  }
   0xe   :  { %736 = vmatprep.subr.bf16.mxu0 %v1808_v7  ;;  %vm325_vm2 = vcmask 523264  }
   0xf   :  { %336 = vmatpush1.bf16.msra.mxu1 %v1830_v11  ;;  %v43_v13 = vshrl.u32 %v42_v12, 7  ;;  %1361 = vmatmul.mubr.msk.bf16.gmra.mrb[4].mxu0 %vm102_vm0, %v1486_v43  ;;  %v1876_v47 = vand.u32 127, %v42_v12 }
  0x10   :  { %414 = vmatprep.subr.bf16.mxu1 %v1777_v0  ;;  %179 = vmatprep.mubr.bf16.mxu0 %v1740_v2 }
  0x11   :  { %737 = vmatpush1.bf16.msra.mxu0 %v1817_v9  ;;  %v44_v14 = vsub.s32 0, %v43_v13  ;;  %v48_v16 = vsub.s32 1, %v43_v13  ;;  %vm282_vm1 = vcmp.lt.s32.totalorder %v1876_v47, 32 }
  0x12   :  { %362 = vmatmul.mubr.bf16.vlgmr.msra.gmra.mrb[0].mxu1 %v1740_v2  ;;  %738 = vmatprep.subr.bf16.mxu0 %v1822_v10 }
  0x13   :  { %415 = vmatpush1.bf16.msra.mxu1 %v1782_v1  ;;  %446 = vmatprep.mubr.bf16.mxu1 %v1740_v2  ;;  %v1858_v19 = vrot.slane %v40_v15, %v44_v14  ;;  %v1862_v21 = vrot.slane %v40_v15, %v48_v16 }
  0x14   :  { %416 = vmatprep.subr.bf16.mxu1 %v1790_v3 }
  0x15   :  { %739 = vmatpush1.bf16.msra.mxu0 %v1830_v11 }
  0x16   :  { %949 = vmatprep.subr.bf16.mxu0 %v1777_v0 }
  0x17   :  { %417 = vmatpush1.bf16.msra.mxu1 %v1795_v4 }
  0x18   :  { %418 = vmatprep.subr.bf16.mxu1 %v1808_v7 }
  0x1b   :  { %419 = vmatpush1.bf16.msra.mxu1 %v1817_v9 }
  0x1c   :  { %420 = vmatprep.subr.bf16.mxu1 %v1822_v10 }
  0x1f   :  { %421 = vmatpush1.bf16.msra.mxu1 %v1830_v11 }
  0x20   :  { %549 = vmatprep.subr.bf16.mxu1 %v1777_v0 }
  0xda   :  { %v161_v17 = vpop.f32.mrb[0].mxu0 }
  0xdb   :  { %v163_v18 = vpop.f32.mrb[1].mxu0  ;;  %v162_v23 = vadd.f32 %v161_v17, %v1858_v19 }
  0xdc   :  { %v1860_v20 = vpop.f32.mrb[2].mxu0  ;;  %v164_v24 = vadd.f32 %v163_v18, %v1862_v21 }
  0xdd   :  { %v1864_v22 = vpop.f32.mrb[3].mxu0  ;;  %v166_v59 = vadd.f32 %v1860_v20, %v1858_v19 }
  0xde   :  { %v168_v61 = vadd.f32 %v1864_v22, %v1862_v21 }
  0xe2   :  { %v171_v55 = vpop.f32.mrb[4].mxu0 }
  0xe3   :  { %v173_v56 = vpop.f32.mrb[5].mxu0  ;;  %v172_v60 = vadd.f32 %v171_v55, %v1858_v19 }
  0xe4   :  { %v1899_v57 = vpop.f32.mrb[6].mxu0  ;;  %v174_v62 = vadd.f32 %v173_v56, %v1862_v21 }
  0xe5   :  { %v363_v25 = vpop.f32.mrb[0].mxu1  ;;  %v1901_v58 = vpop.f32.mrb[7].mxu0 }
  0xe6   :  { %v370_v26 = vadd.f32 %v363_v25, %v162_v23  ;;  %v365_v27 = vpop.f32.mrb[1].mxu1 }
  0xe7   :  { %v371_v28 = vadd.f32 %v365_v27, %v164_v24  ;;  %v367_v29 = vpop.f32.mrb[2].mxu1 }
  0xe8   :  { %v1376_v30 = vmul.f32 -1.442695, %v370_v26  ;;  %v368_v31 = vpop.f32.mrb[3].mxu1 }
  0xe9   :  { %v1377_v37 = vmul.f32 -1.442695, %v371_v28 }
  0xea   :  { %1493 = vpow2.f32 %v1376_v30 }
  0xeb   :  { %1495 = vtanh.f32 %v371_v28 }
  0xf4   :  { %v1494_v32 = vpop.eup %1493 }
  0xf5   :  { %v378_v33 = vadd.f32 1.0, %v1494_v32  ;;  %v1496_v34 = vpop.eup %1495 }
  0xf7   :  { %1497 = vrcp.f32 %v378_v33 }
  0xf8   :  { %1499 = vpow2.f32 %v1377_v37 }
 0x101   :  { %v1498_v35 = vpop.eup %1497 }
 0x102   :  { %v386_v36 = vmul.f32 %v1498_v35, %v1496_v34  ;;  %v1500_v38 = vpop.eup %1499  ;;  %v385_v40 = vmul.f32 0.0, %v1498_v35 }
 0x103   :  { %v379_v39 = vadd.f32 1.0, %v1500_v38 }
 0x104   :  { %388 = vrot.lane.b32.xlu0 %v386_v36, %s1741_s3 }
 0x105   :  { %1501 = vrcp.f32 %v379_v39 }
 0x10f   :  { %v1502_v44 = vpop.eup %1501 }
 0x176   :  { %v389_v41 = vpop.permute.xlu0 %388 }
 0x177   :  { %v391_v42 = vadd.f32 %v389_v41, %v385_v40 }
 0x179   :  { %1503 = vtanh.f32 %v391_v42  ;;  %400 = vrot.lane.b32.xlu1 %v391_v42, %s1741_s3 }
 0x183   :  { %v1504_v45 = vpop.eup %1503 }
 0x184   :  { %v393_v46 = vmul.f32 %v1504_v45, %v1502_v44  ;;  %v1487_v44 = vld [vmem:[%s2180_s0 + $0x10] sm:$0xff]  }
 0x185   :  { %1362 = vmatmul.mubr.msk.bf16.gmra.mrb[8].mxu0 %vm102_vm0, %v1487_v44 }
 0x186   :  { %395 = vrot.lane.b32.xlu0 %v393_v46, %s1741_s3  ;;  %189 = vmatprep.mubr.bf16.mxu0 %v1740_v2 }
 0x1eb   :  { %v401_v48 = vpop.permute.xlu1 %400 }
 0x1ec   :  { %v403_v49 = vsel %vm282_vm1, %v401_v48, 0.0  ;;  %v405_v50 = vsel %vm282_vm1, 0.0, %v401_v48 }
 0x1ed   :  { %489 = vrot.lane.b32.xlu1 %v403_v49, %s1741_s3  ;;  %491 = vrot.lane.b32.xlu0 %v405_v50, %s1741_s3 }
 0x1f8   :  { %v396_v51 = vpop.permute.xlu0 %395 }
 0x1f9   :  { %v398_v52 = vsel %vm282_vm1, %v396_v51, 0.0  ;;  %v404_v53 = vsel %vm282_vm1, 0.0, %v396_v51 }
 0x1fa   :  { %v410_v54 = vpack.c.bf16 %v404_v53, %v398_v52 }
 0x1fc   :  { %1378 = vmatmul.mubr.msk.bf16.vlgmr.msra.gmra.mrb[4].mxu1 %vm325_vm2, %v410_v54 }
 0x1fd   :  { %550 = vmatpush1.bf16.msra.mxu1 %v1782_v1  ;;  %581 = vmatprep.mubr.bf16.mxu1 %v1740_v2 }
 0x1fe   :  { %551 = vmatprep.subr.bf16.mxu1 %v1790_v3 }
 0x201   :  { %552 = vmatpush1.bf16.msra.mxu1 %v1795_v4 }
 0x202   :  { %553 = vmatprep.subr.bf16.mxu1 %v1808_v7 }
 0x205   :  { %554 = vmatpush1.bf16.msra.mxu1 %v1817_v9 }
 0x206   :  { %555 = vmatprep.subr.bf16.mxu1 %v1822_v10 }
 0x209   :  { %556 = vmatpush1.bf16.msra.mxu1 %v1830_v11 }
 0x20a   :  { %1120 = vmatprep.subr.bf16.mxu1 %v1777_v0 }
 0x25f   :  { %v490_v33 = vpop.permute.xlu1 %489  ;;  %v492_v35 = vpop.permute.xlu0 %491 }
 0x2cf   :  { %v448_v63 = vpop.f32.mrb[4].mxu1 }
 0x2d0   :  { %v457_v5 = vadd.f32 %v448_v63, %v166_v59  ;;  %v450_v6 = vpop.f32.mrb[5].mxu1 }
 0x2d1   :  { %v458_v8 = vadd.f32 %v450_v6, %v168_v61  ;;  %v452_v12 = vpop.f32.mrb[6].mxu1 }
 0x2d2   :  { %v1379_v13 = vmul.f32 -1.442695, %v457_v5  ;;  %v459_v14 = vadd.f32 %v452_v12, %v172_v60  ;;  %v454_v15 = vpop.f32.mrb[7].mxu1  ;;  %v181_v12 = vpop.f32.mrb[8].mxu0 }
 0x2d3   :  { %v460_v16 = vadd.f32 %v454_v15, %v174_v62  ;;  %v1380_v30 = vmul.f32 -1.442695, %v458_v8 }
 0x2d4   :  { %1505 = vpow2.f32 %v1379_v13  ;;  %v1381_v17 = vmul.f32 -1.442695, %v459_v14  ;;  %v183_v13 = vpop.f32.mrb[9].mxu0 }
 0x2d5   :  { %v1382_v31 = vmul.f32 -1.442695, %v460_v16  ;;  %v185_v14 = vpop.f32.mrb[10].mxu0 }
 0x2d6   :  { %1507 = vpow2.f32 %v1381_v17  ;;  %v187_v15 = vpop.f32.mrb[11].mxu0  ;;  %v182_v17 = vadd.f32 %v181_v12, %v1858_v19 }
 0x2d7   :  { %1509 = vtanh.f32 %v458_v8 }
 0x2de   :  { %v1506_v18 = vpop.eup %1505 }
 0x2df   :  { %v473_v20 = vadd.f32 1.0, %v1506_v18  ;;  %v178_v18 = vadd.f32 %v1901_v58, %v1862_v21 }
 0x2e0   :  { %v1508_v23 = vpop.eup %1507 }
 0x2e1   :  { %1511 = vrcp.f32 %v473_v20  ;;  %v475_v22 = vadd.f32 1.0, %v1508_v23  ;;  %v1510_v24 = vpop.eup %1509  ;;  %v184_v20 = vadd.f32 %v183_v13, %v1862_v21 }
 0x2e2   :  { %1513 = vtanh.f32 %v460_v16  ;;  %v176_v16 = vadd.f32 %v1899_v57, %v1858_v19  ;;  %v186_v57 = vadd.f32 %v185_v14, %v1858_v19 }
 0x2e3   :  { %1515 = vrcp.f32 %v475_v22 }
 0x2e4   :  { %1517 = vpow2.f32 %v1380_v30 }
 0x2e5   :  { %1519 = vpow2.f32 %v1382_v31  ;;  %v188_v31 = vadd.f32 %v187_v15, %v1862_v21 }
 0x2eb   :  { %v1512_v25 = vpop.eup %1511 }
 0x2ec   :  { %v1514_v26 = vpop.eup %1513  ;;  %v497_v27 = vmul.f32 %v1512_v25, %v1510_v24  ;;  %v495_v37 = vmul.f32 %v1512_v25, %v490_v33 }
 0x2ed   :  { %v1516_v28 = vpop.eup %1515 }
 0x2ee   :  { %501 = vrot.lane.b32.xlu1 %v497_v27, %s1741_s3  ;;  %v498_v29 = vmul.f32 %v1516_v28, %v1514_v26  ;;  %v1518_v32 = vpop.eup %1517  ;;  %v496_v41 = vmul.f32 %v1516_v28, %v492_v35 }
 0x2ef   :  { %v1520_v34 = vpop.eup %1519  ;;  %v474_v36 = vadd.f32 1.0, %v1518_v32 }
 0x2f0   :  { %503 = vrot.lane.b32.xlu0 %v498_v29, %s1741_s3  ;;  %v476_v38 = vadd.f32 1.0, %v1520_v34 }
 0x2f1   :  { %1521 = vrcp.f32 %v474_v36 }
 0x2fb   :  { %v1522_v45 = vpop.eup %1521 }
 0x360   :  { %v502_v39 = vpop.permute.xlu1 %501 }
 0x361   :  { %v507_v40 = vadd.f32 %v502_v39, %v495_v37 }
 0x362   :  { %v504_v42 = vpop.permute.xlu0 %503 }
 0x363   :  { %1523 = vtanh.f32 %v507_v40  ;;  %v508_v43 = vadd.f32 %v504_v42, %v496_v41  ;;  %519 = vrot.lane.b32.xlu0 %v507_v40, %s1741_s3 }
 0x364   :  { %1525 = vrcp.f32 %v476_v38 }
 0x365   :  { %1527 = vtanh.f32 %v508_v43 }
 0x36d   :  { %v1524_v46 = vpop.eup %1523 }
 0x36e   :  { %v1526_v48 = vpop.eup %1525  ;;  %v511_v49 = vmul.f32 %v1524_v46, %v1522_v45 }
 0x36f   :  { %v1528_v50 = vpop.eup %1527 }
 0x370   :  { %v512_v51 = vmul.f32 %v1528_v50, %v1526_v48 }
 0x372   :  { %v1445_v52 = vpack.i.bf16 %v512_v51, %v511_v49 }
 0x374   :  { %1446 = vrot.lane.b32.xlu1 %v1445_v52, %s1741_s3 }
 0x378   :  { %529 = vrot.lane.b32.xlu1 %v508_v43, %s1741_s3 }
 0x3d5   :  { %v520_v53 = vpop.permute.xlu0 %519 }
 0x3d6   :  { %v522_v54 = vsel %vm282_vm1, %v520_v53, 0.0 }
 0x3d7   :  { %648 = vrot.lane.b32.xlu0 %v522_v54, %s1741_s3 }
 0x3e6   :  { %v1447_v55 = vpop.permute.xlu1 %1446 }
 0x3e7   :  { %v1449_v56 = vunpack.i.h.bf16 %v1447_v55  ;;  %v1448_v59 = vunpack.i.l.bf16 %v1447_v55  ;;  %v1488_v55 = vld [vmem:[%s2180_s0 + $0x18] sm:$0xff]  }
 0x3e8   :  { %1363 = vmatmul.mubr.msk.bf16.gmra.mrb[12].mxu0 %vm102_vm0, %v1488_v55 }
 0x3e9   :  { %v517_v60 = vsel %vm282_vm1, %v1448_v59, 0.0  ;;  %v527_v61 = vsel %vm282_vm1, %v1449_v56, %v1448_v59  ;;  %v533_v6 = vsel %vm282_vm1, 0.0, %v1449_v56  ;;  %199 = vmatprep.mubr.bf16.mxu0 %v1740_v2  ;;  %v1489_v56 = vld [vmem:[%s2180_s0 + $0x20] sm:$0xff]   ;;  %v1490_v59 = vld [vmem:[%s2180_s0 + $0x28] sm:$0xff]  }
 0x3ea   :  { %v541_v62 = vpack.c.bf16 %v527_v61, %v517_v60  ;;  %v1926_v63 = vpop.permute.xlu1 %529  ;;  %v542_v8 = vpack.c.bf16 %v533_v6, %v533_v6  ;;  %v1491_v60 = vld [vmem:[%s2180_s0 + $0x30] sm:$0xff]   ;;  %v1492_v61 = vld [vmem:[%s2180_s0 + $0x38] sm:$0xff]  }
 0x3eb   :  { %v532_v5 = vsel %vm282_vm1, %v1926_v63, %v520_v53  ;;  %v534_v51 = vsel %vm282_vm1, 0.0, %v1926_v63 }
 0x3ec   :  { %1383 = vmatmul.mubr.msk.bf16.vlgmr.msra.gmra.mrb[8].mxu1 %vm325_vm2, %v541_v62  ;;  %650 = vrot.lane.b32.xlu1 %v532_v5, %s1741_s3 }
 0x3ed   :  { %591 = vmatprep.mubr.bf16.mxu1 %v1740_v2  ;;  %1121 = vmatpush1.bf16.msra.mxu1 %v1782_v1 }
 0x3ee   :  { %1122 = vmatprep.subr.bf16.mxu1 %v1790_v3 }
 0x3f0   :  { %1364 = vmatmul.mubr.msk.bf16.gmra.mrb[16].mxu0 %vm102_vm0, %v1489_v56 }
 0x3f1   :  { %1123 = vmatpush1.bf16.msra.mxu1 %v1795_v4  ;;  %209 = vmatprep.mubr.bf16.mxu0 %v1740_v2 }
 0x3f2   :  { %1124 = vmatprep.subr.bf16.mxu1 %v1808_v7 }
 0x3f4   :  { %1384 = vmatmul.mubr.msk.bf16.gmra.mrb[12].mxu1 %vm325_vm2, %v542_v8 }
 0x3f5   :  { %1125 = vmatpush1.bf16.msra.mxu1 %v1817_v9  ;;  %1152 = vmatprep.mubr.bf16.mxu1 %v1740_v2 }
 0x3f6   :  { %1126 = vmatprep.subr.bf16.mxu1 %v1822_v10 }
 0x3f8   :  { %1365 = vmatmul.mubr.msk.bf16.gmra.mrb[20].mxu0 %vm102_vm0, %v1490_v59 }
 0x3f9   :  { %1127 = vmatpush1.bf16.msra.mxu1 %v1830_v11  ;;  %219 = vmatprep.mubr.bf16.mxu0 %v1740_v2 }
 0x3fa   :  { %1243 = vmatprep.subr.bf16.mxu1 %v1777_v0 }
 0x400   :  { %1366 = vmatmul.mubr.msk.bf16.gmra.mrb[24].mxu0 %vm102_vm0, %v1491_v60 }
 0x401   :  { %229 = vmatprep.mubr.bf16.mxu0 %v1740_v2 }
 0x408   :  { %1367 = vmatmul.mubr.msk.bf16.gmra.mrb[28].mxu0 %vm102_vm0, %v1492_v61 }
 0x409   :  { %764 = vmatprep.mubr.bf16.mxu0 %v1740_v2 }
 0x449   :  { %v649_v8 = vpop.permute.xlu0 %648 }
 0x45e   :  { %v651_v13 = vpop.permute.xlu1 %650 }
 0x4bf   :  { %v583_v23 = vpop.f32.mrb[8].mxu1 }
 0x4c0   :  { %v600_v22 = vadd.f32 %v583_v23, %v176_v16  ;;  %v585_v24 = vpop.f32.mrb[9].mxu1 }
 0x4c1   :  { %v601_v25 = vadd.f32 %v585_v24, %v178_v18  ;;  %v587_v26 = vpop.f32.mrb[10].mxu1 }
 0x4c2   :  { %v1385_v0 = vmul.f32 -1.442695, %v600_v22  ;;  %v602_v27 = vadd.f32 %v587_v26, %v182_v17  ;;  %v589_v28 = vpop.f32.mrb[11].mxu1 }
 0x4c3   :  { %v603_v29 = vadd.f32 %v589_v28, %v184_v20  ;;  %v1386_v62 = vmul.f32 -1.442695, %v601_v25 }
 0x4c4   :  { %1529 = vpow2.f32 %v1385_v0  ;;  %v1387_v30 = vmul.f32 -1.442695, %v602_v27 }
 0x4c5   :  { %v1388_v63 = vmul.f32 -1.442695, %v603_v29 }
 0x4c6   :  { %1531 = vpow2.f32 %v1387_v30 }
 0x4c7   :  { %v593_v32 = vpop.f32.mrb[12].mxu1 }
 0x4c8   :  { %v604_v58 = vadd.f32 %v593_v32, %v186_v57  ;;  %v595_v33 = vpop.f32.mrb[13].mxu1 }
 0x4c9   :  { %v605_v34 = vadd.f32 %v595_v33, %v188_v31  ;;  %v597_v35 = vpop.f32.mrb[14].mxu1 }
 0x4ca   :  { %v1389_v36 = vmul.f32 -1.442695, %v604_v58  ;;  %v598_v37 = vpop.f32.mrb[15].mxu1 }
 0x4cb   :  { %v1390_v5 = vmul.f32 -1.442695, %v605_v34 }
 0x4cc   :  { %1533 = vpow2.f32 %v1389_v36 }
 0x4cd   :  { %1535 = vtanh.f32 %v601_v25 }
 0x4ce   :  { %v1530_v38 = vpop.eup %1529 }
 0x4cf   :  { %v624_v39 = vadd.f32 1.0, %v1530_v38 }
 0x4d0   :  { %v1532_v40 = vpop.eup %1531 }
 0x4d1   :  { %1537 = vrcp.f32 %v624_v39  ;;  %v626_v41 = vadd.f32 1.0, %v1532_v40 }
 0x4d2   :  { %1539 = vtanh.f32 %v603_v29 }
 0x4d3   :  { %1541 = vrcp.f32 %v626_v41 }
 0x4d4   :  { %1543 = vtanh.f32 %v605_v34 }
 0x4d6   :  { %v1534_v42 = vpop.eup %1533 }
 0x4d7   :  { %v628_v43 = vadd.f32 1.0, %v1534_v42  ;;  %v1536_v44 = vpop.eup %1535  ;;  %v1995_v42 = vpop.f32.mrb[24].mxu0 }
 0x4d9   :  { %1545 = vrcp.f32 %v628_v43 }
 0x4da   :  { %1547 = vpow2.f32 %v1386_v62 }
 0x4db   :  { %v1538_v45 = vpop.eup %1537  ;;  %1549 = vpow2.f32 %v1388_v63 }
 0x4dc   :  { %v1540_v46 = vpop.eup %1539  ;;  %v660_v48 = vmul.f32 %v1538_v45, %v1536_v44  ;;  %1551 = vpow2.f32 %v1390_v5  ;;  %v657_v15 = vmul.f32 %v1538_v45, %v649_v8 }
 0x4dd   :  { %v1542_v49 = vpop.eup %1541 }
 0x4de   :  { %666 = vrot.lane.b32.xlu0 %v660_v48, %s1741_s3  ;;  %v661_v50 = vmul.f32 %v1542_v49, %v1540_v46  ;;  %v1544_v52 = vpop.eup %1543  ;;  %v658_v20 = vmul.f32 %v1542_v49, %v651_v13  ;;  %v1999_v48 = vpop.f32.mrb[25].mxu0 }
 0x4df   :  { %v2003_v49 = vpop.f32.mrb[26].mxu0 }
 0x4e0   :  { %668 = vrot.lane.b32.xlu1 %v661_v50, %s1741_s3  ;;  %v2006_v50 = vpop.f32.mrb[27].mxu0 }
 0x4e2   :  { %652 = vrot.lane.b32.xlu0 %v534_v51, %s1741_s3 }
 0x4e3   :  { %v1546_v53 = vpop.eup %1545 }
 0x4e4   :  { %v662_v54 = vmul.f32 %v1546_v53, %v1544_v52  ;;  %v1548_v6 = vpop.eup %1547 }
 0x4e5   :  { %v1550_v12 = vpop.eup %1549  ;;  %v625_v14 = vadd.f32 1.0, %v1548_v6 }
 0x4e6   :  { %670 = vrot.lane.b32.xlu1 %v662_v54, %s1741_s3  ;;  %v627_v16 = vadd.f32 1.0, %v1550_v12  ;;  %v1552_v22 = vpop.eup %1551 }
 0x4e7   :  { %1553 = vrcp.f32 %v625_v14  ;;  %v629_v26 = vadd.f32 1.0, %v1552_v22 }
 0x4f1   :  { %v1554_v29 = vpop.eup %1553 }
 0x550   :  { %v667_v17 = vpop.permute.xlu0 %666 }
 0x551   :  { %v675_v18 = vadd.f32 %v667_v17, %v657_v15 }
 0x552   :  { %v669_v23 = vpop.permute.xlu1 %668 }
 0x553   :  { %1555 = vtanh.f32 %v675_v18  ;;  %v676_v24 = vadd.f32 %v669_v23, %v658_v20 }
 0x554   :  { %1557 = vrcp.f32 %v627_v16  ;;  %v653_v25 = vpop.permute.xlu0 %652 }
 0x555   :  { %1559 = vtanh.f32 %v676_v24  ;;  %v659_v0 = vmul.f32 %v1546_v53, %v653_v25 }
 0x556   :  { %1561 = vrcp.f32 %v629_v26 }
 0x558   :  { %v671_v27 = vpop.permute.xlu1 %670 }
 0x559   :  { %v677_v28 = vadd.f32 %v671_v27, %v659_v0 }
 0x55b   :  { %1563 = vtanh.f32 %v677_v28 }
 0x55d   :  { %v1556_v30 = vpop.eup %1555 }
 0x55e   :  { %v1558_v57 = vpop.eup %1557  ;;  %v681_v31 = vmul.f32 %v1556_v30, %v1554_v29 }
 0x55f   :  { %v1560_v32 = vpop.eup %1559 }
 0x560   :  { %v682_v58 = vmul.f32 %v1560_v32, %v1558_v57  ;;  %v1562_v34 = vpop.eup %1561 }
 0x562   :  { %v1450_v33 = vpack.i.bf16 %v682_v58, %v681_v31 }
 0x564   :  { %1451 = vrot.lane.b32.xlu0 %v1450_v33, %s1741_s3 }
 0x565   :  { %v1564_v35 = vpop.eup %1563 }
 0x566   :  { %v683_v36 = vmul.f32 %v1564_v35, %v1562_v34 }
 0x568   :  { %690 = vrot.lane.b32.xlu0 %v675_v18, %s1741_s3  ;;  %705 = vrot.lane.b32.xlu1 %v683_v36, %s1741_s3 }
 0x56c   :  { %710 = vrot.lane.b32.xlu0 %v677_v28, %s1741_s3  ;;  %700 = vrot.lane.b32.xlu1 %v676_v24, %s1741_s3 }
 0x5d6   :  { %v1452_v37 = vpop.permute.xlu0 %1451 }
 0x5d7   :  { %v1454_v38 = vunpack.i.h.bf16 %v1452_v37  ;;  %v1453_v39 = vunpack.i.l.bf16 %v1452_v37 }
 0x5d9   :  { %v688_v40 = vsel %vm282_vm1, %v1453_v39, 0.0  ;;  %v698_v41 = vsel %vm282_vm1, %v1454_v38, %v1453_v39 }
 0x5da   :  { %v724_v43 = vpack.c.bf16 %v698_v41, %v688_v40  ;;  %v706_v44 = vpop.permute.xlu1 %705  ;;  %v691_v45 = vpop.permute.xlu0 %690 }
 0x5db   :  { %v693_v46 = vsel %vm282_vm1, %v691_v45, 0.0  ;;  %v708_v53 = vsel %vm282_vm1, %v706_v44, %v1454_v38  ;;  %v714_v54 = vsel %vm282_vm1, 0.0, %v706_v44 }
 0x5dc   :  { %849 = vrot.lane.b32.xlu1 %v693_v46, %s1741_s3  ;;  %1391 = vmatmul.mubr.msk.bf16.vlgmr.msra.gmra.mrb[12].mxu0 %vm325_vm2, %v724_v43 }
 0x5dd   :  { %774 = vmatprep.mubr.bf16.mxu0 %v1740_v2  ;;  %950 = vmatpush1.bf16.msra.mxu0 %v1782_v1  ;;  %v2023_v1 = vpop.f32.mrb[28].mxu0 }
 0x5de   :  { %v701_v51 = vpop.permute.xlu1 %700  ;;  %v2009_v52 = vpop.permute.xlu0 %710  ;;  %951 = vmatprep.subr.bf16.mxu0 %v1790_v3  ;;  %v725_v3 = vpack.c.bf16 %v714_v54, %v708_v53 }
 0x5df   :  { %v703_v55 = vsel %vm282_vm1, %v701_v51, %v691_v45  ;;  %v713_v56 = vsel %vm282_vm1, %v2009_v52, %v701_v51  ;;  %v2026_v59 = vpop.f32.mrb[29].mxu0  ;;  %v715_v37 = vsel %vm282_vm1, 0.0, %v2009_v52 }
 0x5e0   :  { %851 = vrot.lane.b32.xlu0 %v703_v55, %s1741_s3  ;;  %853 = vrot.lane.b32.xlu1 %v713_v56, %s1741_s3  ;;  %v2029_v60 = vpop.f32.mrb[30].mxu0 }
 0x5e1   :  { %952 = vmatpush1.bf16.msra.mxu0 %v1795_v4  ;;  %v2032_v61 = vpop.f32.mrb[31].mxu0 }
 0x5e2   :  { %953 = vmatprep.subr.bf16.mxu0 %v1808_v7 }
 0x5e4   :  { %1392 = vmatmul.mubr.msk.bf16.gmra.mrb[16].mxu0 %vm325_vm2, %v725_v3 }
 0x5e5   :  { %954 = vmatpush1.bf16.msra.mxu0 %v1817_v9  ;;  %981 = vmatprep.mubr.bf16.mxu0 %v1740_v2 }
 0x5e6   :  { %955 = vmatprep.subr.bf16.mxu0 %v1822_v10 }
 0x5e9   :  { %956 = vmatpush1.bf16.msra.mxu0 %v1830_v11 }
 0x64e   :  { %v850_v46 = vpop.permute.xlu1 %849 }
 0x652   :  { %v852_v52 = vpop.permute.xlu0 %851  ;;  %v854_v55 = vpop.permute.xlu1 %853 }
 0x6af   :  { %v766_v4 = vpop.f32.mrb[12].mxu0 }
 0x6b0   :  { %v1417_v62 = vadd.f32 %v766_v4, %v1858_v19  ;;  %v768_v63 = vpop.f32.mrb[13].mxu0 }
 0x6b1   :  { %v770_v5 = vpop.f32.mrb[14].mxu0  ;;  %v1418_v17 = vadd.f32 %v768_v63, %v1862_v21 }
 0x6b2   :  { %v1393_v7 = vmul.f32 -1.442695, %v1417_v62  ;;  %v1419_v6 = vadd.f32 %v770_v5, %v1858_v19  ;;  %v772_v8 = vpop.f32.mrb[15].mxu0 }
 0x6b3   :  { %v1420_v23 = vadd.f32 %v772_v8, %v1862_v21  ;;  %v1394_v43 = vmul.f32 -1.442695, %v1418_v17 }
 0x6b4   :  { %1565 = vpow2.f32 %v1393_v7  ;;  %v1395_v12 = vmul.f32 -1.442695, %v1419_v6 }
 0x6b5   :  { %v1396_v44 = vmul.f32 -1.442695, %v1420_v23 }
 0x6b6   :  { %1567 = vpow2.f32 %v1395_v12 }
 0x6b7   :  { %v776_v13 = vpop.f32.mrb[16].mxu0 }
 0x6b8   :  { %v1421_v9 = vadd.f32 %v776_v13, %v1858_v19  ;;  %v778_v14 = vpop.f32.mrb[17].mxu0 }
 0x6b9   :  { %v780_v15 = vpop.f32.mrb[18].mxu0  ;;  %v1422_v26 = vadd.f32 %v778_v14, %v1862_v21 }
 0x6ba   :  { %v1397_v10 = vmul.f32 -1.442695, %v1421_v9  ;;  %v1423_v11 = vadd.f32 %v780_v15, %v1858_v19  ;;  %v782_v16 = vpop.f32.mrb[19].mxu0 }
 0x6bb   :  { %v1424_v30 = vadd.f32 %v782_v16, %v1862_v21  ;;  %v1398_v45 = vmul.f32 -1.442695, %v1422_v26 }
 0x6bc   :  { %1569 = vpow2.f32 %v1397_v10  ;;  %v1399_v18 = vmul.f32 -1.442695, %v1423_v11 }
 0x6bd   :  { %v1400_v51 = vmul.f32 -1.442695, %v1424_v30 }
 0x6be   :  { %v1566_v20 = vpop.eup %1565  ;;  %1571 = vpow2.f32 %v1399_v18 }
 0x6bf   :  { %v817_v22 = vadd.f32 1.0, %v1566_v20  ;;  %1573 = vtanh.f32 %v1418_v17 }
 0x6c0   :  { %v1568_v24 = vpop.eup %1567 }
 0x6c1   :  { %1575 = vrcp.f32 %v817_v22  ;;  %v819_v25 = vadd.f32 1.0, %v1568_v24 }
 0x6c2   :  { %1577 = vtanh.f32 %v1420_v23 }
 0x6c3   :  { %1579 = vrcp.f32 %v819_v25 }
 0x6c4   :  { %1581 = vtanh.f32 %v1422_v26 }
 0x6c6   :  { %v1570_v0 = vpop.eup %1569 }
 0x6c7   :  { %v821_v27 = vadd.f32 1.0, %v1570_v0 }
 0x6c8   :  { %v1572_v28 = vpop.eup %1571 }
 0x6c9   :  { %1583 = vrcp.f32 %v821_v27  ;;  %v823_v29 = vadd.f32 1.0, %v1572_v28  ;;  %v1574_v57 = vpop.eup %1573 }
 0x6cb   :  { %v1576_v31 = vpop.eup %1575  ;;  %1585 = vrcp.f32 %v823_v29 }
 0x6cc   :  { %v1578_v32 = vpop.eup %1577  ;;  %v865_v58 = vmul.f32 %v1576_v31, %v1574_v57  ;;  %1587 = vtanh.f32 %v1424_v30  ;;  %v861_v3 = vmul.f32 %v1576_v31, %v850_v46 }
 0x6cd   :  { %v1580_v33 = vpop.eup %1579  ;;  %1589 = vpow2.f32 %v1394_v43 }
 0x6ce   :  { %873 = vrot.lane.b32.xlu0 %v865_v58, %s1741_s3  ;;  %v866_v34 = vmul.f32 %v1580_v33, %v1578_v32  ;;  %v1582_v35 = vpop.eup %1581  ;;  %1591 = vpow2.f32 %v1396_v44  ;;  %v862_v5 = vmul.f32 %v1580_v33, %v852_v52 }
 0x6cf   :  { %1593 = vpow2.f32 %v1398_v45 }
 0x6d0   :  { %875 = vrot.lane.b32.xlu1 %v866_v34, %s1741_s3  ;;  %1595 = vpow2.f32 %v1400_v51 }
 0x6d3   :  { %v1584_v36 = vpop.eup %1583 }
 0x6d4   :  { %855 = vrot.lane.b32.xlu1 %v715_v37, %s1741_s3  ;;  %v867_v38 = vmul.f32 %v1584_v36, %v1582_v35  ;;  %v863_v9 = vmul.f32 %v1584_v36, %v854_v55 }
 0x6d5   :  { %v1586_v39 = vpop.eup %1585 }
 0x6d6   :  { %877 = vrot.lane.b32.xlu0 %v867_v38, %s1741_s3  ;;  %v1588_v40 = vpop.eup %1587 }
 0x6d7   :  { %v868_v41 = vmul.f32 %v1588_v40, %v1586_v39  ;;  %v1590_v53 = vpop.eup %1589 }
 0x6d8   :  { %v1592_v54 = vpop.eup %1591  ;;  %v818_v56 = vadd.f32 1.0, %v1590_v53 }
 0x6d9   :  { %v820_v4 = vadd.f32 1.0, %v1592_v54  ;;  %v1594_v6 = vpop.eup %1593 }
 0x6da   :  { %879 = vrot.lane.b32.xlu0 %v868_v41, %s1741_s3  ;;  %1597 = vrcp.f32 %v818_v56  ;;  %v822_v12 = vadd.f32 1.0, %v1594_v6  ;;  %v1596_v13 = vpop.eup %1595 }
 0x6db   :  { %v824_v11 = vadd.f32 1.0, %v1596_v13 }
 0x6e4   :  { %v1598_v17 = vpop.eup %1597 }
 0x740   :  { %v874_v62 = vpop.permute.xlu0 %873 }
 0x741   :  { %v885_v63 = vadd.f32 %v874_v62, %v861_v3 }
 0x742   :  { %v876_v7 = vpop.permute.xlu1 %875 }
 0x743   :  { %1599 = vtanh.f32 %v885_v63  ;;  %v886_v8 = vadd.f32 %v876_v7, %v862_v5  ;;  %v222_v5 = vadd.f32 %v1995_v42, %v1858_v19  ;;  %v224_v7 = vadd.f32 %v1999_v48, %v1862_v21 }
 0x744   :  { %1601 = vrcp.f32 %v820_v4 }
 0x745   :  { %1603 = vtanh.f32 %v886_v8 }
 0x746   :  { %v856_v14 = vpop.permute.xlu1 %855  ;;  %1605 = vrcp.f32 %v822_v12 }
 0x747   :  { %v864_v16 = vmul.f32 %v1586_v39, %v856_v14 }
 0x748   :  { %v878_v15 = vpop.permute.xlu0 %877 }
 0x749   :  { %v887_v10 = vadd.f32 %v878_v15, %v863_v9 }
 0x74b   :  { %1607 = vtanh.f32 %v887_v10 }
 0x74c   :  { %v880_v18 = vpop.permute.xlu0 %879  ;;  %1609 = vrcp.f32 %v824_v11 }
 0x74d   :  { %v1600_v20 = vpop.eup %1599  ;;  %v888_v23 = vadd.f32 %v880_v18, %v864_v16 }
 0x74e   :  { %v1602_v22 = vpop.eup %1601  ;;  %v893_v24 = vmul.f32 %v1600_v20, %v1598_v17 }
 0x74f   :  { %v1604_v25 = vpop.eup %1603  ;;  %1611 = vtanh.f32 %v888_v23 }
 0x750   :  { %v894_v26 = vmul.f32 %v1604_v25, %v1602_v22  ;;  %v1606_v27 = vpop.eup %1605 }
 0x752   :  { %v1455_v0 = vpack.i.bf16 %v893_v24, %v894_v26 }
 0x754   :  { %1456 = vrot.lane.b32.xlu1 %v1455_v0, %s1741_s3 }
 0x755   :  { %v1608_v28 = vpop.eup %1607 }
 0x756   :  { %v895_v29 = vmul.f32 %v1608_v28, %v1606_v27  ;;  %v1610_v30 = vpop.eup %1609 }
 0x758   :  { %916 = vrot.lane.b32.xlu0 %v895_v29, %s1741_s3 }
 0x759   :  { %v1612_v57 = vpop.eup %1611 }
 0x75a   :  { %v896_v31 = vmul.f32 %v1612_v57, %v1610_v30 }
 0x75c   :  { %907 = vrot.lane.b32.xlu0 %v886_v8, %s1741_s3  ;;  %926 = vrot.lane.b32.xlu1 %v896_v31, %s1741_s3 }
 0x760   :  { %921 = vrot.lane.b32.xlu0 %v887_v10, %s1741_s3  ;;  %911 = vrot.lane.b32.xlu1 %v885_v63, %s1741_s3 }
 0x764   :  { %931 = vrot.lane.b32.xlu1 %v888_v23, %s1741_s3 }
 0x7c6   :  { %v1457_v32 = vpop.permute.xlu1 %1456 }
 0x7c7   :  { %v1459_v58 = vunpack.i.h.bf16 %v1457_v32  ;;  %v1458_v33 = vunpack.i.l.bf16 %v1457_v32 }
 0x7c9   :  { %v905_v35 = vsel %vm282_vm1, %v1458_v33, %v1459_v58 }
 0x7ca   :  { %v917_v34 = vpop.permute.xlu0 %916 }
 0x7cb   :  { %v919_v36 = vsel %vm282_vm1, %v917_v34, %v1458_v33 }
 0x7cc   :  { %v941_v37 = vpack.c.bf16 %v919_v36, %v905_v35 }
 0x7ce   :  { %1401 = vmatmul.mubr.msk.bf16.vlgmr.msra.gmra.mrb[20].mxu0 %vm325_vm2, %v941_v37  ;;  %v908_v38 = vpop.permute.xlu0 %907  ;;  %v927_v39 = vpop.permute.xlu1 %926 }
 0x7cf   :  { %991 = vmatprep.mubr.bf16.mxu0 %v1740_v2  ;;  %v929_v40 = vsel %vm282_vm1, %v927_v39, %v917_v34 }
 0x7d0   :  { %v942_v46 = vpack.c.bf16 %v929_v40, %v929_v40 }
 0x7d2   :  { %v922_v41 = vpop.permute.xlu0 %921  ;;  %v912_v43 = vpop.permute.xlu1 %911 }
 0x7d3   :  { %v924_v44 = vsel %vm282_vm1, %v922_v41, %v908_v38  ;;  %v914_v45 = vsel %vm282_vm1, %v908_v38, %v912_v43 }
 0x7d4   :  { %1050 = vrot.lane.b32.xlu1 %v924_v44, %s1741_s3  ;;  %1048 = vrot.lane.b32.xlu0 %v914_v45, %s1741_s3 }
 0x7d6   :  { %1402 = vmatmul.mubr.msk.bf16.gmra.mrb[32].mxu0 %vm325_vm2, %v942_v46  ;;  %v932_v51 = vpop.permute.xlu1 %931 }
 0x7d7   :  { %v934_v53 = vsel %vm282_vm1, %v932_v51, %v922_v41 }
 0x7d8   :  { %1052 = vrot.lane.b32.xlu0 %v934_v53, %s1741_s3 }
 0x846   :  { %v1049_v32 = vpop.permute.xlu0 %1048  ;;  %v1051_v33 = vpop.permute.xlu1 %1050 }
 0x84a   :  { %v1053_v35 = vpop.permute.xlu0 %1052 }
 0x8a1   :  { %v983_v52 = vpop.f32.mrb[20].mxu0 }
 0x8a2   :  { %v1425_v54 = vadd.f32 %v983_v52, %v1858_v19  ;;  %v985_v55 = vpop.f32.mrb[21].mxu0 }
 0x8a3   :  { %v987_v56 = vpop.f32.mrb[22].mxu0  ;;  %v1426_v10 = vadd.f32 %v985_v55, %v1862_v21 }
 0x8a4   :  { %v1403_v3 = vmul.f32 -1.442695, %v1425_v54  ;;  %v1427_v4 = vadd.f32 %v987_v56, %v1858_v19  ;;  %v989_v62 = vpop.f32.mrb[23].mxu0 }
 0x8a5   :  { %v1428_v16 = vadd.f32 %v989_v62, %v1862_v21  ;;  %v1404_v30 = vmul.f32 -1.442695, %v1426_v10 }
 0x8a6   :  { %1613 = vpow2.f32 %v1403_v3  ;;  %v1405_v63 = vmul.f32 -1.442695, %v1427_v4 }
 0x8a7   :  { %v1406_v57 = vmul.f32 -1.442695, %v1428_v16 }
 0x8a8   :  { %1615 = vpow2.f32 %v1405_v63 }
 0x8a9   :  { %v993_v6 = vpop.f32.mrb[32].mxu0 }
 0x8aa   :  { %v1004_v8 = vadd.f32 %v993_v6, %v222_v5  ;;  %v995_v12 = vpop.f32.mrb[33].mxu0 }
 0x8ab   :  { %v1005_v13 = vadd.f32 %v995_v12, %v224_v7  ;;  %v997_v9 = vpop.f32.mrb[34].mxu0 }
 0x8ac   :  { %v1407_v14 = vmul.f32 -1.442695, %v1004_v8  ;;  %v998_v15 = vpop.f32.mrb[35].mxu0 }
 0x8ad   :  { %v1408_v31 = vmul.f32 -1.442695, %v1005_v13 }
 0x8ae   :  { %1617 = vpow2.f32 %v1407_v14 }
 0x8af   :  { %1619 = vtanh.f32 %v1426_v10 }
 0x8b0   :  { %v1614_v11 = vpop.eup %1613 }
 0x8b1   :  { %v1024_v17 = vadd.f32 1.0, %v1614_v11 }
 0x8b2   :  { %v1616_v18 = vpop.eup %1615 }
 0x8b3   :  { %1621 = vrcp.f32 %v1024_v17  ;;  %v1026_v42 = vadd.f32 1.0, %v1616_v18 }
 0x8b4   :  { %1623 = vtanh.f32 %v1428_v16 }
 0x8b5   :  { %1625 = vrcp.f32 %v1026_v42 }
 0x8b6   :  { %1627 = vtanh.f32 %v1005_v13 }
 0x8b8   :  { %v1618_v48 = vpop.eup %1617 }
 0x8b9   :  { %v1028_v20 = vadd.f32 1.0, %v1618_v48  ;;  %v1620_v23 = vpop.eup %1619  ;;  %v1685_v48 = vld [vmem:[%s2182_s2] ss:$8 sps:$4 sm:$0xff]  }
 0x8bb   :  { %1629 = vrcp.f32 %v1028_v20  ;;  %v1686_v20 = vld [vmem:[%s2182_s2 + $0x14] ss:$8 sps:$4 sm:$0xff]  }
 0x8bc   :  { %1631 = vpow2.f32 %v1404_v30 }
 0x8bd   :  { %v1622_v22 = vpop.eup %1621  ;;  %1633 = vpow2.f32 %v1406_v57  ;;  %v234_v57 = vadd.f32 %v2026_v59, %v1862_v21 }
 0x8be   :  { %v1624_v24 = vpop.eup %1623  ;;  %v1060_v25 = vmul.f32 %v1622_v22, %v1620_v23  ;;  %1635 = vpow2.f32 %v1408_v31  ;;  %v1057_v37 = vmul.f32 %v1622_v22, %v1049_v32  ;;  %v1687_v23 = vld [vmem:[%s2182_s2 + $0x10] ss:$8 sps:$4 sm:$0xff]   ;;  %v1688_v22 = vld [vmem:[%s2182_s2 + $0x24] ss:$8 sps:$4 sm:$0xff]  }
 0x8bf   :  { %v1626_v26 = vpop.eup %1625 }
 0x8c0   :  { %1066 = vrot.lane.b32.xlu1 %v1060_v25, %s1741_s3  ;;  %v1061_v0 = vmul.f32 %v1626_v26, %v1624_v24  ;;  %v1628_v27 = vpop.eup %1627  ;;  %v1058_v41 = vmul.f32 %v1626_v26, %v1051_v33  ;;  %v1690_v24 = vld [vmem:[%s2182_s2 + $0x34] ss:$8 sps:$4 sm:$0xff]   ;;  %v1691_v25 = vld [vmem:[%s2182_s2 + $0x30] ss:$8 sps:$4 sm:$0xff]   ;;  %v226_v26 = vadd.f32 %v2003_v49, %v1858_v19 }
 0x8c2   :  { %1068 = vrot.lane.b32.xlu0 %v1061_v0, %s1741_s3  ;;  %v228_v0 = vadd.f32 %v2006_v50, %v1862_v21 }
 0x8c5   :  { %v1630_v28 = vpop.eup %1629 }
 0x8c6   :  { %v1062_v29 = vmul.f32 %v1630_v28, %v1628_v27  ;;  %v1632_v58 = vpop.eup %1631  ;;  %v1059_v51 = vmul.f32 %v1630_v28, %v1053_v35  ;;  %v232_v28 = vadd.f32 %v2023_v1, %v1858_v19 }
 0x8c7   :  { %v1634_v34 = vpop.eup %1633  ;;  %v1025_v36 = vadd.f32 1.0, %v1632_v58 }
 0x8c8   :  { %1070 = vrot.lane.b32.xlu1 %v1062_v29, %s1741_s3  ;;  %v1027_v38 = vadd.f32 1.0, %v1634_v34  ;;  %v1636_v44 = vpop.eup %1635 }
 0x8c9   :  { %1637 = vrcp.f32 %v1025_v36  ;;  %v1029_v46 = vadd.f32 1.0, %v1636_v44 }
 0x8d3   :  { %v1638_v54 = vpop.eup %1637 }
 0x932   :  { %v1067_v39 = vpop.permute.xlu1 %1066 }
 0x933   :  { %v1075_v40 = vadd.f32 %v1067_v39, %v1057_v37 }
 0x934   :  { %v1069_v43 = vpop.permute.xlu0 %1068 }
 0x935   :  { %1639 = vtanh.f32 %v1075_v40  ;;  %v1076_v45 = vadd.f32 %v1069_v43, %v1058_v41 }
 0x936   :  { %1641 = vrcp.f32 %v1027_v38 }
 0x937   :  { %1643 = vtanh.f32 %v1076_v45 }
 0x938   :  { %1645 = vrcp.f32 %v1029_v46 }
 0x93a   :  { %v1071_v53 = vpop.permute.xlu1 %1070 }
 0x93b   :  { %v1077_v52 = vadd.f32 %v1071_v53, %v1059_v51 }
 0x93d   :  { %1647 = vtanh.f32 %v1077_v52 }
 0x93f   :  { %v1640_v55 = vpop.eup %1639 }
 0x940   :  { %v1642_v56 = vpop.eup %1641  ;;  %v1081_v3 = vmul.f32 %v1640_v55, %v1638_v54 }
 0x941   :  { %v1644_v4 = vpop.eup %1643 }
 0x942   :  { %v1082_v62 = vmul.f32 %v1644_v4, %v1642_v56  ;;  %v1646_v5 = vpop.eup %1645 }
 0x944   :  { %v1460_v63 = vpack.i.bf16 %v1081_v3, %v1082_v62 }
 0x946   :  { %1461 = vrot.lane.b32.xlu0 %v1460_v63, %s1741_s3 }
 0x947   :  { %v1648_v7 = vpop.eup %1647 }
 0x948   :  { %v1083_v6 = vmul.f32 %v1648_v7, %v1646_v5 }
 0x94a   :  { %1094 = vrot.lane.b32.xlu0 %v1076_v45, %s1741_s3  ;;  %1103 = vrot.lane.b32.xlu1 %v1083_v6, %s1741_s3 }
 0x94e   :  { %1108 = vrot.lane.b32.xlu0 %v1077_v52, %s1741_s3  ;;  %1098 = vrot.lane.b32.xlu1 %v1075_v40, %s1741_s3 }
 0x9b8   :  { %v1462_v8 = vpop.permute.xlu0 %1461 }
 0x9b9   :  { %v1464_v12 = vunpack.i.h.bf16 %v1462_v8  ;;  %v1463_v13 = vunpack.i.l.bf16 %v1462_v8 }
 0x9bb   :  { %v1092_v15 = vsel %vm282_vm1, %v1463_v13, %v1464_v12 }
 0x9bc   :  { %v1095_v9 = vpop.permute.xlu0 %1094  ;;  %v1104_v14 = vpop.permute.xlu1 %1103 }
 0x9bd   :  { %v1106_v10 = vsel %vm282_vm1, %v1104_v14, %v1463_v13 }
 0x9be   :  { %v1116_v11 = vpack.c.bf16 %v1106_v10, %v1092_v15 }
 0x9c0   :  { %v1109_v16 = vpop.permute.xlu0 %1108  ;;  %1409 = vmatmul.mubr.msk.bf16.vlgmr.msra.gmra.mrb[16].mxu1 %vm325_vm2, %v1116_v11  ;;  %v1099_v17 = vpop.permute.xlu1 %1098 }
 0x9c1   :  { %v1111_v18 = vsel %vm282_vm1, %v1109_v16, %v1095_v9  ;;  %v1101_v42 = vsel %vm282_vm1, %v1095_v9, %v1099_v17  ;;  %1244 = vmatpush1.bf16.msra.mxu1 %v1685_v48  ;;  %1275 = vmatprep.mubr.bf16.mxu1 %v1740_v2  ;;  %v1689_v2 = vld [vmem:[%s2182_s2 + $0x20] ss:$8 sps:$4 sm:$0xff]   ;;  %s1742_s2 = smov [#allocation5]  }
 0x9c2   :  { %1197 = vrot.lane.b32.xlu0 %v1111_v18, %s1741_s3  ;;  %1195 = vrot.lane.b32.xlu1 %v1101_v42, %s1741_s3  ;;  %s1338_s17 = sshll.u32 %s1742_s2, 4  ;;  %s1339_s17 = int_to_ptr.vmem [resolvable:$true] %s1338_s17 }
 0x9c3   :  { %1245 = vmatprep.subr.bf16.mxu1 %v1686_v20  ;;  %v236_v20 = vadd.f32 %v2029_v60, %v1858_v19  ;;  %s1692_s18 = scalar_lea.vmem %s1339_s17, 128  ;;  %p1697_p1 = scmp.lt.s32.totalorder %s1339_s17, %s1339_s17 }
 0x9c4   :  { %p1693_p0 = scmp.ne.s32.totalorder %s1339_s17, %s1692_s18  ;;  %p1698_p2 = scmp.lt.s32.totalorder %s1692_s18, %s1692_s18 }
 0x9c5   :  { %1246 = vmatpush1.bf16.msra.mxu1 %v1687_v23  ;;  %v238_v23 = vadd.f32 %v2032_v61, %v1862_v21 }
 0x9c6   :  { %1247 = vmatprep.subr.bf16.mxu1 %v1688_v22  ;;  %p1699_p3 = por %p1698_p2, %p1697_p1 }
 0x9c8   :  { %p1700_p4 = pnand %p1699_p3, %p1693_p0 }
 0x9c9   :  { %1248 = vmatpush1.bf16.msra.mxu1 %v1689_v2 }
 0x9ca   :  { %1249 = vmatprep.subr.bf16.mxu1 %v1690_v24 }
 0x9cd   :  { %1250 = vmatpush1.bf16.msra.mxu1 %v1691_v25 }
 0xa34   :  { %v1196_v51 = vpop.permute.xlu1 %1195  ;;  %v1198_v52 = vpop.permute.xlu0 %1197 }
 0xa93   :  { %v1154_v27 = vpop.f32.mrb[16].mxu1 }
 0xa94   :  { %v1163_v29 = vadd.f32 %v1154_v27, %v226_v26  ;;  %v1156_v30 = vpop.f32.mrb[17].mxu1 }
 0xa95   :  { %v1164_v31 = vadd.f32 %v1156_v30, %v228_v0  ;;  %v1158_v32 = vpop.f32.mrb[18].mxu1 }
 0xa96   :  { %v1410_v58 = vmul.f32 -1.442695, %v1163_v29  ;;  %v1165_v33 = vadd.f32 %v1158_v32, %v232_v28  ;;  %v1160_v34 = vpop.f32.mrb[19].mxu1 }
 0xa97   :  { %v1166_v35 = vadd.f32 %v1160_v34, %v234_v57  ;;  %v1411_v44 = vmul.f32 -1.442695, %v1164_v31 }
 0xa98   :  { %1649 = vpow2.f32 %v1410_v58  ;;  %v1412_v49 = vmul.f32 -1.442695, %v1165_v33 }
 0xa99   :  { %v1413_v45 = vmul.f32 -1.442695, %v1166_v35 }
 0xa9a   :  { %1651 = vpow2.f32 %v1412_v49 }
 0xa9b   :  { %1653 = vtanh.f32 %v1164_v31 }
 0xaa2   :  { %v1650_v36 = vpop.eup %1649 }
 0xaa3   :  { %v1179_v50 = vadd.f32 1.0, %v1650_v36 }
 0xaa4   :  { %v1652_v37 = vpop.eup %1651 }
 0xaa5   :  { %1655 = vrcp.f32 %v1179_v50  ;;  %v1181_v1 = vadd.f32 1.0, %v1652_v37  ;;  %v1654_v38 = vpop.eup %1653 }
 0xaa6   :  { %1657 = vtanh.f32 %v1166_v35 }
 0xaa7   :  { %1659 = vrcp.f32 %v1181_v1 }
 0xaa8   :  { %1661 = vpow2.f32 %v1411_v44 }
 0xaa9   :  { %1663 = vpow2.f32 %v1413_v45 }
 0xaaf   :  { %v1656_v39 = vpop.eup %1655 }
 0xab0   :  { %v1658_v59 = vpop.eup %1657  ;;  %v1203_v40 = vmul.f32 %v1656_v39, %v1654_v38  ;;  %v1201_v55 = vmul.f32 %v1656_v39, %v1196_v51 }
 0xab1   :  { %v1660_v41 = vpop.eup %1659 }
 0xab2   :  { %1207 = vrot.lane.b32.xlu1 %v1203_v40, %s1741_s3  ;;  %v1204_v43 = vmul.f32 %v1660_v41, %v1658_v59  ;;  %v1662_v46 = vpop.eup %1661  ;;  %v1202_v62 = vmul.f32 %v1660_v41, %v1198_v52 }
 0xab3   :  { %v1664_v53 = vpop.eup %1663  ;;  %v1180_v54 = vadd.f32 1.0, %v1662_v46 }
 0xab4   :  { %1209 = vrot.lane.b32.xlu0 %v1204_v43, %s1741_s3  ;;  %v1182_v56 = vadd.f32 1.0, %v1664_v53 }
 0xab5   :  { %1665 = vrcp.f32 %v1180_v54 }
 0xabf   :  { %v1666_v7 = vpop.eup %1665 }
 0xb24   :  { %v1208_v3 = vpop.permute.xlu1 %1207 }
 0xb25   :  { %v1213_v4 = vadd.f32 %v1208_v3, %v1201_v55 }
 0xb26   :  { %v1210_v63 = vpop.permute.xlu0 %1209 }
 0xb27   :  { %1667 = vtanh.f32 %v1213_v4  ;;  %v1214_v5 = vadd.f32 %v1210_v63, %v1202_v62 }
 0xb28   :  { %1669 = vrcp.f32 %v1182_v56 }
 0xb29   :  { %1671 = vtanh.f32 %v1214_v5  ;;  %1229 = vrot.lane.b32.xlu0 %v1214_v5, %s1741_s3 }
 0xb31   :  { %v1668_v6 = vpop.eup %1667 }
 0xb32   :  { %v1670_v8 = vpop.eup %1669  ;;  %v1217_v12 = vmul.f32 %v1668_v6, %v1666_v7 }
 0xb33   :  { %v1672_v13 = vpop.eup %1671 }
 0xb34   :  { %v1218_v9 = vmul.f32 %v1672_v13, %v1670_v8 }
 0xb36   :  { %v1465_v14 = vpack.i.bf16 %v1217_v12, %v1218_v9 }
 0xb38   :  { %1466 = vrot.lane.b32.xlu1 %v1465_v14, %s1741_s3 }
 0xb3c   :  { %1233 = vrot.lane.b32.xlu1 %v1213_v4, %s1741_s3 }
 0xb9b   :  { %v1230_v17 = vpop.permute.xlu0 %1229 }
 0xbaa   :  { %v1467_v15 = vpop.permute.xlu1 %1466 }
 0xbab   :  { %v1469_v10 = vunpack.i.h.bf16 %v1467_v15  ;;  %v1468_v11 = vunpack.i.l.bf16 %v1467_v15 }
 0xbad   :  { %v1227_v16 = vsel %vm282_vm1, %v1468_v11, %v1469_v10 }
 0xbae   :  { %v1239_v18 = vpack.c.bf16 %v1227_v16, %v1227_v16  ;;  %v1234_v42 = vpop.permute.xlu1 %1233 }
 0xbaf   :  { %v1236_v48 = vsel %vm282_vm1, %v1230_v17, %v1234_v42 }
 0xbb0   :  { %1300 = vrot.lane.b32.xlu0 %v1236_v48, %s1741_s3  ;;  %1414 = vmatmul.mubr.msk.bf16.vlgmr.msra.gmra.mrb[20].mxu1 %vm325_vm2, %v1239_v18 }
 0xc22   :  { %v1301_v60 = vpop.permute.xlu0 %1300 }
 0xc83   :  { %v1277_v22 = vpop.f32.mrb[20].mxu1 }
 0xc84   :  { %v1284_v2 = vadd.f32 %v1277_v22, %v236_v20  ;;  %v1279_v24 = vpop.f32.mrb[21].mxu1 }
 0xc85   :  { %v1285_v25 = vadd.f32 %v1279_v24, %v238_v23  ;;  %v1281_v26 = vpop.f32.mrb[22].mxu1 }
 0xc86   :  { %v1415_v0 = vmul.f32 -1.442695, %v1284_v2  ;;  %v1282_v27 = vpop.f32.mrb[23].mxu1 }
 0xc87   :  { %v1416_v19 = vmul.f32 -1.442695, %v1285_v25 }
 0xc88   :  { %1673 = vpow2.f32 %v1415_v0 }
 0xc89   :  { %1675 = vtanh.f32 %v1285_v25 }
 0xc92   :  { %v1674_v47 = vpop.eup %1673 }
 0xc93   :  { %v1292_v28 = vadd.f32 1.0, %v1674_v47  ;;  %v1676_v29 = vpop.eup %1675 }
 0xc95   :  { %1677 = vrcp.f32 %v1292_v28 }
 0xc96   :  { %1679 = vpow2.f32 %v1416_v19 }
 0xc9f   :  { %v1678_v30 = vpop.eup %1677 }
 0xca0   :  { %v1304_v57 = vmul.f32 %v1678_v30, %v1676_v29  ;;  %v1680_v21 = vpop.eup %1679  ;;  %v1303_v31 = vmul.f32 %v1678_v30, %v1301_v60 }
 0xca1   :  { %v1293_v61 = vadd.f32 1.0, %v1680_v21 }
 0xca2   :  { %1306 = vrot.lane.b32.xlu1 %v1304_v57, %s1741_s3 }
 0xca3   :  { %1681 = vrcp.f32 %v1293_v61 }
 0xcad   :  { %v1682_v33 = vpop.eup %1681 }
 0xd14   :  { %v1307_v32 = vpop.permute.xlu1 %1306 }
 0xd15   :  { %v1309_v58 = vadd.f32 %v1307_v32, %v1303_v31 }
 0xd17   :  { %1683 = vtanh.f32 %v1309_v58  ;;  %1318 = vrot.lane.b32.xlu1 %v1309_v58, %s1741_s3 }
 0xd21   :  { %v1684_v34 = vpop.eup %1683 }
 0xd22   :  { %v1311_v35 = vmul.f32 %v1684_v34, %v1682_v33 }
 0xd24   :  { %1313 = vrot.lane.b32.xlu0 %v1311_v35, %s1741_s3 }
 0xd89   :  { %v1319_v49 = vpop.permute.xlu1 %1318 }
 0xd8a   :  { %1321 = vst.msk [vmem:[#allocation5] sm:$0xff] %vm325_vm2, %v1319_v49 }
 0xd8b   :  { %1703 = shalt.err (!%p1700_p4)
}
 0xd8c   :  { %s1704_s21 = scalar_lea.hbm %s2185_s5, 128 }
 0xd8d   :  { %p1705_p5 = scmp.ne.s32.totalorder %s2185_s5, %s1704_s21  ;;  %p1708_p6 = scmp.lt.u32.totalorder %s1704_s21, %s2185_s5 }
 0xd8f   :  { %p1710_p7 = pnand %p1708_p6, %p1705_p5 }
 0xd91   :  { %1713 = shalt.err (!%p1710_p7)
}
 0xd92   :  { %1341 = dma.vmem_to_hbm [thread:$0]  %s1339_s17, 128, %s2185_s5, [#allocation6]  }
 0xd93   :  { %s1743_s27 = smov [#allocation3]  }
 0xd94   :  { %s1328_s28 = sshll.u32 %s1743_s27, 4  ;;  %s1329_s28 = int_to_ptr.vmem [resolvable:$true] %s1328_s28 }
 0xd95   :  { %s1714_s29 = scalar_lea.vmem %s1329_s28, 128  ;;  %p1719_p9 = scmp.lt.s32.totalorder %s1329_s28, %s1329_s28 }
 0xd96   :  { %v1314_v36 = vpop.permute.xlu0 %1313  ;;  %p1715_p8 = scmp.ne.s32.totalorder %s1329_s28, %s1714_s29  ;;  %p1720_p10 = scmp.lt.s32.totalorder %s1714_s29, %s1714_s29 }
 0xd97   :  { %1316 = vst.msk [vmem:[#allocation3] sm:$0xff] %vm325_vm2, %v1314_v36 }
 0xd98   :  { %p1721_p11 = por %p1720_p10, %p1719_p9 }
 0xd9a   :  { %p1722_p12 = pnand %p1721_p11, %p1715_p8 }
 0xd9c   :  { %1725 = shalt.err (!%p1722_p12)
}
 0xd9d   :  { %s1726_s6 = scalar_lea.hbm %s2184_s4, 128 }
 0xd9e   :  { %p1727_p13 = scmp.ne.s32.totalorder %s2184_s4, %s1726_s6  ;;  %p1730_p0 = scmp.lt.u32.totalorder %s1726_s6, %s2184_s4 }
 0xda0   :  { %p1732_p1 = pnand %p1730_p0, %p1727_p13 }
 0xda2   :  { %1735 = shalt.err (!%p1732_p1)
}
 0xda3   :  { %1331 = dma.vmem_to_hbm [thread:$0]  %s1329_s28, 128, %s2184_s4, [#allocation4]  }
 0xda4   :  { %1736 = dma.done.wait [#allocation4], 128  }
 0xda5   :  { %1737 = vsyncadd [#allocation4], 4294967168 }
 0xda6   :  { %1738 = dma.done.wait [#allocation6], 128  }
 0xda7   :  { %1739 = vsyncadd [#allocation6], 4294967168 }
 0xda8   :  { %1348 = vsyncpa [#allocation4], 1 }
 0xda9   :  { %1349 = vsyncpa [#allocation6], 1 }

</bundles_post_ra>
